<compile_context>
chip_gen: v6e
topology: v6e:2x2x1
jax: 0.10.0
libtpu: 0.0.40
codegen_flags: <defaults>
</compile_context>

<pallas_src>
import functools

import jax
import jax.numpy as jnp
from jax.experimental import pallas as pl
from jax.experimental.pallas import tpu as pltpu

OUTPUT_LEN = 10   # hard-coded output_len in TiDE / TemporalDecoder
_LANE = 128       # weight-slab lane width (one lane tile)


def _full_spec(shape):
    nd = len(shape)
    return pl.BlockSpec(shape, lambda *_: (0,) * nd)


# --------------------------------------------------------------------------
# In-kernel building blocks (operate on values, not refs)
# --------------------------------------------------------------------------
def _layer_norm(x, g, beta, eps=1e-5):
    mean = jnp.mean(x, axis=-1, keepdims=True)
    var = jnp.mean(jnp.square(x - mean), axis=-1, keepdims=True)
    return (x - mean) * jax.lax.rsqrt(var + eps) * g + beta


def _attn_context(h2, w, v_row, batch, seq):
    """Per-batch softmax attention pooling over the seq axis.

    h2: (batch*seq, H) flat slab with each batch's rows contiguous.
    Returns (batch, H).  Segment-mask formulation: no per-batch Python loop,
    no slice/concatenate copies, and the `v` projection is an elementwise
    multiply + lane reduce instead of an N=1 MXU matmul.
    """
    rows = batch * seq
    s = jnp.tanh(jnp.dot(h2, w, preferred_element_type=jnp.float32))      # (rows, H)
    e = jnp.sum(s * v_row, axis=-1, keepdims=True)                        # (rows, 1)

    rid = jax.lax.broadcasted_iota(jnp.int32, (rows, batch), 0)           # row index
    cid = jax.lax.broadcasted_iota(jnp.int32, (rows, batch), 1)           # batch index
    seg = (rid >= cid * seq) & (rid < (cid + 1) * seq)                    # (rows, batch)
    segf = seg.astype(jnp.float32)

    seg_max = jnp.max(jnp.where(seg, e, -jnp.inf), axis=0, keepdims=True)  # (1, batch)
    row_max = jnp.sum(segf * seg_max, axis=-1, keepdims=True)              # (rows, 1)
    p = jnp.exp(e - row_max)                                               # (rows, 1)
    seg_sum = jnp.sum(segf * p, axis=0, keepdims=True)                     # (1, batch)
    row_den = jnp.sum(segf * seg_sum, axis=-1, keepdims=True)              # (rows, 1)
    attn = p / row_den                                                     # (rows, 1)

    rid_t = jax.lax.broadcasted_iota(jnp.int32, (batch, rows), 1)
    cid_t = jax.lax.broadcasted_iota(jnp.int32, (batch, rows), 0)
    seg_t = ((rid_t >= cid_t * seq) & (rid_t < (cid_t + 1) * seq)).astype(jnp.float32)
    return jnp.dot(seg_t, attn * h2, preferred_element_type=jnp.float32)   # (batch, H)


# --------------------------------------------------------------------------
# The single fused kernel for the whole forward pass
# --------------------------------------------------------------------------
def _tide_fused_kernel(x_ref, cov_ref, w_ref, out_ref, *,
                       layout, num_enc, batch, seq, out_len, inter, hid):
    f32 = jnp.float32

    def P(name):
        # Static slice of the packed weight slab (vld at point of use; keeps
        # vreg pressure low even with the fully unrolled decode loop).
        r0, nr, nc = layout[name]
        return w_ref[r0:r0 + nr, :nc]

    x2 = x_ref[...]                                                   # (B*S, F)

    # FeatureProjection and the global-residual linear share the same LHS and
    # the same relu -> weights pre-fused along lanes; slice the columns.
    fg = jnp.maximum(
        jnp.dot(x2, P("fpgr_w"), preferred_element_type=f32) + P("fpgr_b"), 0.0)
    h = fg[:, :inter]                                                 # FeatureProjection
    g = fg[:, inter:inter + hid]                                      # global residual

    # Encoder: residual blocks with [linear1 | shortcut] fused along lanes.
    for i in range(num_enc):
        hw = (jnp.dot(h, P(f"enc{i}_w1ws"), preferred_element_type=f32)
              + P(f"enc{i}_b1bs"))                                    # (B*S, 2H)
        pre = jnp.maximum(hw[:, :hid], 0.0)
        res = hw[:, hid:2 * hid]
        o = (jnp.dot(pre, P(f"enc{i}_w2"), preferred_element_type=f32)
             + P(f"enc{i}_b2"))
        # nn.Dropout(0.5) in eval mode == identity.
        h = _layer_norm(o + res, P(f"enc{i}_g"), P(f"enc{i}_beta"))
    encoded = h                                                       # (B*S, H)

    # NOTE: the reference TiDE also runs a dense Decoder on encoded_x, but its
    # output is never used by TiDE.forward -> omitted (identical outputs).

    # Global residual path: attention-pooled context, added to every step.
    g_ctx = _attn_context(g, P("ga_w"), P("ga_v"), batch, seq)        # (B, H)

    # Covariate-side work is independent of the recurrence -> hoisted out of
    # the decode loop as two slab matmuls over all out_len steps at once.
    cov2 = cov_ref[...]                                               # (out_len*B, F)
    proj = jnp.maximum(
        jnp.dot(cov2, P("cp_w"), preferred_element_type=f32) + P("cp_b"), 0.0)
    pre_all = (jnp.dot(proj, P("trb_covw"), preferred_element_type=f32)
               + P("trb_b1bs"))                                       # (out_len*B, 2H)

    # Temporal decoder.  Step 0 attends over the full encoder output; for
    # steps >= 1 the recurrent state has sequence length 1, so the softmax is
    # identically 1 and the context is exactly the previous step's output.
    ctx = _attn_context(encoded, P("td_attn_w"), P("td_attn_v"), batch, seq)
    ctx_w = P("trb_ctxw")                                             # (H, 2H)
    w2v, b2v = P("trb_w2"), P("trb_b2")
    gv, bv = P("trb_g"), P("trb_beta")
    for t in range(out_len):                                          # tiny, unrolled
        hw = (jnp.dot(ctx, ctx_w, preferred_element_type=f32)
              + pre_all[t * batch:(t + 1) * batch, :])                # (B, 2H)
        pre = jnp.maximum(hw[:, :hid], 0.0)
        res = hw[:, hid:2 * hid]
        o = jnp.dot(pre, w2v, preferred_element_type=f32) + b2v
        x_t = _layer_norm(o + res, gv, bv)                            # (B, H)
        # Store into the 2D (out_len*B, H) output layout (fused global residual).
        out_ref[t * batch:(t + 1) * batch, :] = (x_t + g_ctx).astype(out_ref.dtype)
        ctx = x_t


# --------------------------------------------------------------------------
# Wrapper: pack weights into one slab, present 2D data layouts, one pallas_call
# --------------------------------------------------------------------------
def _pack_params(params):
    trb = params["td_rb"]
    named = [
        ("fpgr_w", jnp.concatenate([params["fp_w"], params["gr_w"]], axis=1)),
        ("fpgr_b", jnp.concatenate([params["fp_b"], params["gr_b"]], axis=1)),
    ]
    for i, blk in enumerate(params["encoder"]):
        named += [
            (f"enc{i}_w1ws", jnp.concatenate([blk["w1"], blk["ws"]], axis=1)),
            (f"enc{i}_b1bs", jnp.concatenate([blk["b1"], blk["bs"]], axis=1)),
            (f"enc{i}_w2", blk["w2"]),
            (f"enc{i}_b2", blk["b2"]),
            (f"enc{i}_g", blk["g"]),
            (f"enc{i}_beta", blk["beta"]),
        ]
    named += [
        ("ga_w", params["ga_w"]),
        ("ga_v", params["ga_v"].reshape(1, -1)),
        ("td_attn_w", params["td_attn_w"]),
        ("td_attn_v", params["td_attn_v"].reshape(1, -1)),
        ("cp_w", params["td_cov_w"]),
        ("cp_b", params["td_cov_b"]),
        ("trb_ctxw", jnp.concatenate([trb["w1_ctx"], trb["ws_ctx"]], axis=1)),
        ("trb_covw", jnp.concatenate([trb["w1_cov"], trb["ws_cov"]], axis=1)),
        ("trb_b1bs", jnp.concatenate([trb["b1"], trb["bs"]], axis=1)),
        ("trb_w2", trb["w2"]),
        ("trb_b2", trb["b2"]),
        ("trb_g", trb["g"]),
        ("trb_beta", trb["beta"]),
    ]
    layout, pieces, row = {}, [], 0
    for name, a in named:
        a = jnp.asarray(a, jnp.float32)
        r, c = a.shape
        assert c <= _LANE
        pad_r = (-r) % 8  # keep every param's row offset sublane-aligned
        pieces.append(jnp.pad(a, ((0, pad_r), (0, _LANE - c))))
        layout[name] = (row, r, c)
        row += r + pad_r
    return jnp.concatenate(pieces, axis=0), layout


def tide_forward(params, x, covariates):
    batch, seq, fin = x.shape
    out_len = covariates.shape[1]
    inter = params["fp_w"].shape[1]
    hid = params["gr_w"].shape[1]

    # Layout plumbing (cheap XLA ops outside the kernel): 2D activation slabs
    # with contiguous per-batch / per-step rows, plus the packed weight slab.
    x2d = x.reshape(batch * seq, fin)
    cov2d = jnp.transpose(covariates, (1, 0, 2)).reshape(out_len * batch, fin)
    slab, layout = _pack_params(params)

    kernel = functools.partial(
        _tide_fused_kernel, layout=layout, num_enc=len(params["encoder"]),
        batch=batch, seq=seq, out_len=out_len, inter=inter, hid=hid)

    out2d = pl.pallas_call(
        kernel,
        grid=(1,),
        out_shape=jax.ShapeDtypeStruct((out_len * batch, hid), jnp.float32),
        in_specs=[_full_spec(x2d.shape), _full_spec(cov2d.shape),
                  _full_spec(slab.shape)],
        out_specs=_full_spec((out_len * batch, hid)),
        compiler_params=pltpu.CompilerParams(dimension_semantics=("arbitrary",)),
    )(x2d, cov2d, slab)
    # NOTE: at much larger batch*seq, give the encoder rows a leading
    # "parallel" grid axis (uses v7x's 2nd TensorCore); at these sizes a
    # single full-array block is optimal.
    return jnp.transpose(out2d.reshape(out_len, batch, hid), (1, 0, 2))


# --------------------------------------------------------------------------
# Pure-JAX reference (literal translation of the PyTorch module, incl. the
# per-step softmax over the length-1 recurrent state) for self-validation.
# --------------------------------------------------------------------------
def _ref_layer_norm(x, g, b, eps=1e-5):
    m = jnp.mean(x, axis=-1, keepdims=True)
    v = jnp.mean(jnp.square(x - m), axis=-1, keepdims=True)
    return (x - m) / jnp.sqrt(v + eps) * g + b


def _ref_residual_block(x, p):
    res = x @ p["ws"] + p["bs"]
    out = jnp.maximum(x @ p["w1"] + p["b1"], 0.0)
    out = out @ p["w2"] + p["b2"]
    return _ref_layer_norm(out + res, p["g"], p["beta"])


def _ref_attention(x, W, v):
    e = jnp.tanh(x @ W) @ v
    return jax.nn.softmax(e, axis=1)


def tide_reference(params, x, covariates):
    enc = jnp.maximum(x @ params["fp_w"] + params["fp_b"], 0.0)
    for blk in params["encoder"]:
        enc = _ref_residual_block(enc, blk)
    trb = params["td_rb"]
    rb = dict(w1=jnp.concatenate([trb["w1_ctx"], trb["w1_cov"]], axis=0),
              ws=jnp.concatenate([trb["ws_ctx"], trb["ws_cov"]], axis=0),
              b1=trb["b1"], w2=trb["w2"], b2=trb["b2"], bs=trb["bs"],
              g=trb["g"], beta=trb["beta"])
    xs, outs = enc, []
    for t in range(OUTPUT_LEN):
        attn = _ref_attention(xs, params["td_attn_w"], params["td_attn_v"])
        context = jnp.sum(attn * xs, axis=1, keepdims=True)
        pc = jnp.maximum(covariates[:, t, :] @ params["td_cov_w"]
                         + params["td_cov_b"], 0.0)[:, None, :]
        xs = _ref_residual_block(jnp.concatenate([context, pc], axis=-1), rb)
        outs.append(xs[:, 0, :])
    final = jnp.stack(outs, axis=1)
    gr = jnp.maximum(x @ params["gr_w"] + params["gr_b"], 0.0)
    ga = _ref_attention(gr, params["ga_w"], params["ga_v"])
    return final + jnp.sum(ga * gr, axis=1)[:, None, :]


# --------------------------------------------------------------------------
# Parameter initialization (deterministic, synthetic weights)
# --------------------------------------------------------------------------
def init_linear(key, fin, fout):
    k1, k2 = jax.random.split(key)
    w = jax.random.normal(k1, (fin, fout), jnp.float32) * 0.1
    b = jax.random.normal(k2, (1, fout), jnp.float32) * 0.1
    return w, b


def init_residual_block(key, fin, fout):
    k1, k2, k3, k4 = jax.random.split(key, 4)
    w1, b1 = init_linear(k1, fin, fout)
    w2, b2 = init_linear(k2, fout, fout)
    ws, bs = init_linear(k3, fin, fout)
    g = 1.0 + 0.1 * jax.random.normal(k4, (1, fout), jnp.float32)
    beta = jnp.zeros((1, fout), jnp.float32)
    return dict(w1=w1, b1=b1, w2=w2, b2=b2, ws=ws, bs=bs, g=g, beta=beta)


def init_tide(key, input_size, num_enc, num_dec, output_dim, intermediate_dim):
    keys = jax.random.split(key, 11)
    params = {}
    params["fp_w"], params["fp_b"] = init_linear(keys[0], input_size, intermediate_dim)

    enc = []
    k = keys[1]
    for i in range(num_enc):
        k, sub = jax.random.split(k)
        fin = intermediate_dim if i == 0 else output_dim
        enc.append(init_residual_block(sub, fin, output_dim))
    params["encoder"] = enc

    # Dense decoder params exist in the reference module but its output is
    # dead in TiDE.forward, so the fused kernel never touches them.
    dec = []
    k = keys[2]
    for _ in range(num_dec):
        k, sub = jax.random.split(k)
        dec.append(init_residual_block(sub, output_dim, output_dim))
    params["decoder"] = dec
    params["dec_lin_w"], params["dec_lin_b"] = init_linear(keys[3], output_dim, output_dim)

    # Temporal decoder (in = out = hidden = output_dim, cov = input_size).
    params["td_attn_w"] = jax.random.normal(keys[4], (output_dim, output_dim), jnp.float32) * 0.1
    params["td_attn_v"] = jax.random.normal(keys[5], (output_dim, 1), jnp.float32) * 0.1
    rb = init_residual_block(keys[6], 2 * output_dim, output_dim)
    h = output_dim
    params["td_rb"] = dict(
        w1_ctx=rb["w1"][:h], w1_cov=rb["w1"][h:],
        ws_ctx=rb["ws"][:h], ws_cov=rb["ws"][h:],
        b1=rb["b1"], w2=rb["w2"], b2=rb["b2"], bs=rb["bs"],
        g=rb["g"], beta=rb["beta"])
    params["td_cov_w"], params["td_cov_b"] = init_linear(keys[7], input_size, output_dim)

    # Global residual path.
    params["gr_w"], params["gr_b"] = init_linear(keys[8], input_size, output_dim)
    params["ga_w"] = jax.random.normal(keys[9], (output_dim, output_dim), jnp.float32) * 0.1
    params["ga_v"] = jax.random.normal(keys[10], (output_dim, 1), jnp.float32) * 0.1
    return params


# --------------------------------------------------------------------------
if __name__ == "__main__":
    key = jax.random.PRNGKey(0)
    # output_dim must be 5: the PyTorch TemporalDecoder hard-codes 5 outputs.
    input_size, num_enc, num_dec, output_dim, intermediate_dim = 8, 2, 2, 5, 16
    B, S = 2, 8

    kp, kx, kc = jax.random.split(key, 3)
    params = init_tide(kp, input_size, num_enc, num_dec, output_dim, intermediate_dim)
    x = jax.random.normal(kx, (B, S, input_size), jnp.float32)
    covariates = jax.random.normal(kc, (B, OUTPUT_LEN, input_size), jnp.float32)

    out = jax.jit(tide_forward)(params, x, covariates)
    jax.block_until_ready(out)
    assert out.shape == (B, OUTPUT_LEN, output_dim)
    assert bool(jnp.all(jnp.isfinite(out)))

    # Self-check against the literal (per-step attention) pure-JAX reference.
    with jax.default_matmul_precision("highest"):
        ref = tide_reference(params, x, covariates)
    max_err = float(jnp.max(jnp.abs(out - ref)))
    assert max_err < 5e-2, f"mismatch vs reference: max_abs_err={max_err}"

    print("KERNEL_OK")
</pallas_src>

<mosaic_0001>
module attributes {stable_mosaic.version = 11 : i64} {
  func.func @_tide_fused_kernel(%arg0: i32, %arg1: memref<16x8xf32, #tpu.memory_space<vmem>>, %arg2: memref<20x8xf32, #tpu.memory_space<vmem>>, %arg3: memref<224x128xf32, #tpu.memory_space<vmem>>, %arg4: memref<20x5xf32, #tpu.memory_space<vmem>>) attributes {dimension_semantics = [#tpu.dimension_semantics<arbitrary>], iteration_bounds = array<i64: 1>, scalar_prefetch = 0 : i64, scratch_operands = 0 : i64, tpu.core_type = #tpu.core_type<tc>, window_params = [{pipeline_mode = #tpu.pipeline_mode<synchronous>, transform_indices = @transform_0, window_bounds = array<i64: 16, 8>}, {pipeline_mode = #tpu.pipeline_mode<synchronous>, transform_indices = @transform_1, window_bounds = array<i64: 20, 8>}, {pipeline_mode = #tpu.pipeline_mode<synchronous>, transform_indices = @transform_2, window_bounds = array<i64: 224, 128>}, {pipeline_mode = #tpu.pipeline_mode<synchronous>, transform_indices = @transform_3, window_bounds = array<i64: 20, 5>}]} {
    %c0 = arith.constant 0 : index
    %c0_0 = arith.constant 0 : index
    %0 = vector.load %arg1[%c0, %c0_0] : memref<16x8xf32, #tpu.memory_space<vmem>>, vector<16x8xf32>
    %c0_1 = arith.constant 0 : index
    %c0_2 = arith.constant 0 : index
    %1 = vector.load %arg3[%c0_1, %c0_2] : memref<224x128xf32, #tpu.memory_space<vmem>>, vector<8x21xf32>
    %cst = arith.constant dense<0.000000e+00> : vector<16x21xf32>
    %2 = tpu.matmul %0, %1, %cst {dimension_numbers = #tpu.dot_dimension_numbers<[1], [0], [0], [1], [0, 0, 1, 1], [], []>} : vector<16x8xf32>, vector<8x21xf32>, vector<16x21xf32> -> vector<16x21xf32>
    %c8 = arith.constant 8 : index
    %c0_3 = arith.constant 0 : index
    %3 = vector.load %arg3[%c8, %c0_3] : memref<224x128xf32, #tpu.memory_space<vmem>>, vector<1x21xf32>
    %4 = vector.broadcast %3 : vector<1x21xf32> to vector<16x21xf32>
    %5 = arith.addf %2, %4 : vector<16x21xf32>
    %cst_4 = arith.constant 0.000000e+00 : f32
    %6 = vector.broadcast %cst_4 : f32 to vector<16x21xf32>
    %7 = arith.maximumf %5, %6 : vector<16x21xf32>
    %8 = vector.extract_strided_slice %7 {offsets = [0, 0], sizes = [16, 16], strides = [1, 1]} : vector<16x21xf32> to vector<16x16xf32>
    %9 = vector.extract_strided_slice %7 {offsets = [0, 16], sizes = [16, 5], strides = [1, 1]} : vector<16x21xf32> to vector<16x5xf32>
    %c16 = arith.constant 16 : index
    %c0_5 = arith.constant 0 : index
    %10 = vector.load %arg3[%c16, %c0_5] : memref<224x128xf32, #tpu.memory_space<vmem>>, vector<16x10xf32>
    %cst_6 = arith.constant dense<0.000000e+00> : vector<16x10xf32>
    %11 = tpu.matmul %8, %10, %cst_6 {dimension_numbers = #tpu.dot_dimension_numbers<[1], [0], [0], [1], [0, 0, 1, 1], [], []>} : vector<16x16xf32>, vector<16x10xf32>, vector<16x10xf32> -> vector<16x10xf32>
    %c32 = arith.constant 32 : index
    %c0_7 = arith.constant 0 : index
    %12 = vector.load %arg3[%c32, %c0_7] : memref<224x128xf32, #tpu.memory_space<vmem>>, vector<1x10xf32>
    %13 = vector.broadcast %12 : vector<1x10xf32> to vector<16x10xf32>
    %14 = arith.addf %11, %13 : vector<16x10xf32>
    %15 = vector.extract_strided_slice %14 {offsets = [0, 0], sizes = [16, 5], strides = [1, 1]} : vector<16x10xf32> to vector<16x5xf32>
    %cst_8 = arith.constant 0.000000e+00 : f32
    %16 = vector.broadcast %cst_8 : f32 to vector<16x5xf32>
    %17 = arith.maximumf %15, %16 : vector<16x5xf32>
    %18 = vector.extract_strided_slice %14 {offsets = [0, 5], sizes = [16, 5], strides = [1, 1]} : vector<16x10xf32> to vector<16x5xf32>
    %c40 = arith.constant 40 : index
    %c0_9 = arith.constant 0 : index
    %19 = vector.load %arg3[%c40, %c0_9] : memref<224x128xf32, #tpu.memory_space<vmem>>, vector<5x5xf32>
    %cst_10 = arith.constant dense<0.000000e+00> : vector<16x5xf32>
    %20 = tpu.matmul %17, %19, %cst_10 {dimension_numbers = #tpu.dot_dimension_numbers<[1], [0], [0], [1], [0, 0, 1, 1], [], []>} : vector<16x5xf32>, vector<5x5xf32>, vector<16x5xf32> -> vector<16x5xf32>
    %c48 = arith.constant 48 : index
    %c0_11 = arith.constant 0 : index
    %21 = vector.load %arg3[%c48, %c0_11] : memref<224x128xf32, #tpu.memory_space<vmem>>, vector<1x5xf32>
    %22 = vector.broadcast %21 : vector<1x5xf32> to vector<16x5xf32>
    %23 = arith.addf %20, %22 : vector<16x5xf32>
    %24 = arith.addf %23, %18 : vector<16x5xf32>
    %c56 = arith.constant 56 : index
    %c0_12 = arith.constant 0 : index
    %25 = vector.load %arg3[%c56, %c0_12] : memref<224x128xf32, #tpu.memory_space<vmem>>, vector<1x5xf32>
    %c64 = arith.constant 64 : index
    %c0_13 = arith.constant 0 : index
    %26 = vector.load %arg3[%c64, %c0_13] : memref<224x128xf32, #tpu.memory_space<vmem>>, vector<1x5xf32>
    %cst_14 = arith.constant dense<0.000000e+00> : vector<16xf32>
    %27 = vector.multi_reduction <add>, %24, %cst_14 [1] : vector<16x5xf32> to vector<16xf32>
    %28 = vector.shape_cast %27 : vector<16xf32> to vector<16x1xf32>
    %cst_15 = arith.constant 5.000000e+00 : f32
    %29 = vector.broadcast %cst_15 : f32 to vector<16x1xf32>
    %30 = arith.divf %28, %29 : vector<16x1xf32>
    %31 = vector.broadcast %30 : vector<16x1xf32> to vector<16x5xf32>
    %32 = arith.subf %24, %31 : vector<16x5xf32>
    %33 = arith.mulf %32, %32 : vector<16x5xf32>
    %cst_16 = arith.constant dense<0.000000e+00> : vector<16xf32>
    %34 = vector.multi_reduction <add>, %33, %cst_16 [1] : vector<16x5xf32> to vector<16xf32>
    %35 = vector.shape_cast %34 : vector<16xf32> to vector<16x1xf32>
    %cst_17 = arith.constant 5.000000e+00 : f32
    %36 = vector.broadcast %cst_17 : f32 to vector<16x1xf32>
    %37 = arith.divf %35, %36 : vector<16x1xf32>
    %38 = vector.broadcast %30 : vector<16x1xf32> to vector<16x5xf32>
    %39 = arith.subf %24, %38 : vector<16x5xf32>
    %cst_18 = arith.constant 9.99999974E-6 : f32
    %40 = vector.broadcast %cst_18 : f32 to vector<16x1xf32>
    %41 = arith.addf %37, %40 : vector<16x1xf32>
    %42 = math.rsqrt %41 : vector<16x1xf32>
    %43 = vector.broadcast %42 : vector<16x1xf32> to vector<16x5xf32>
    %44 = arith.mulf %39, %43 : vector<16x5xf32>
    %45 = vector.broadcast %25 : vector<1x5xf32> to vector<16x5xf32>
    %46 = arith.mulf %44, %45 : vector<16x5xf32>
    %47 = vector.broadcast %26 : vector<1x5xf32> to vector<16x5xf32>
    %48 = arith.addf %46, %47 : vector<16x5xf32>
    %c72 = arith.constant 72 : index
    %c0_19 = arith.constant 0 : index
    %49 = vector.load %arg3[%c72, %c0_19] : memref<224x128xf32, #tpu.memory_space<vmem>>, vector<5x10xf32>
    %cst_20 = arith.constant dense<0.000000e+00> : vector<16x10xf32>
    %50 = tpu.matmul %48, %49, %cst_20 {dimension_numbers = #tpu.dot_dimension_numbers<[1], [0], [0], [1], [0, 0, 1, 1], [], []>} : vector<16x5xf32>, vector<5x10xf32>, vector<16x10xf32> -> vector<16x10xf32>
    %c80 = arith.constant 80 : index
    %c0_21 = arith.constant 0 : index
    %51 = vector.load %arg3[%c80, %c0_21] : memref<224x128xf32, #tpu.memory_space<vmem>>, vector<1x10xf32>
    %52 = vector.broadcast %51 : vector<1x10xf32> to vector<16x10xf32>
    %53 = arith.addf %50, %52 : vector<16x10xf32>
    %54 = vector.extract_strided_slice %53 {offsets = [0, 0], sizes = [16, 5], strides = [1, 1]} : vector<16x10xf32> to vector<16x5xf32>
    %cst_22 = arith.constant 0.000000e+00 : f32
    %55 = vector.broadcast %cst_22 : f32 to vector<16x5xf32>
    %56 = arith.maximumf %54, %55 : vector<16x5xf32>
    %57 = vector.extract_strided_slice %53 {offsets = [0, 5], sizes = [16, 5], strides = [1, 1]} : vector<16x10xf32> to vector<16x5xf32>
    %c88 = arith.constant 88 : index
    %c0_23 = arith.constant 0 : index
    %58 = vector.load %arg3[%c88, %c0_23] : memref<224x128xf32, #tpu.memory_space<vmem>>, vector<5x5xf32>
    %cst_24 = arith.constant dense<0.000000e+00> : vector<16x5xf32>
    %59 = tpu.matmul %56, %58, %cst_24 {dimension_numbers = #tpu.dot_dimension_numbers<[1], [0], [0], [1], [0, 0, 1, 1], [], []>} : vector<16x5xf32>, vector<5x5xf32>, vector<16x5xf32> -> vector<16x5xf32>
    %c96 = arith.constant 96 : index
    %c0_25 = arith.constant 0 : index
    %60 = vector.load %arg3[%c96, %c0_25] : memref<224x128xf32, #tpu.memory_space<vmem>>, vector<1x5xf32>
    %61 = vector.broadcast %60 : vector<1x5xf32> to vector<16x5xf32>
    %62 = arith.addf %59, %61 : vector<16x5xf32>
    %63 = arith.addf %62, %57 : vector<16x5xf32>
    %c104 = arith.constant 104 : index
    %c0_26 = arith.constant 0 : index
    %64 = vector.load %arg3[%c104, %c0_26] : memref<224x128xf32, #tpu.memory_space<vmem>>, vector<1x5xf32>
    %c112 = arith.constant 112 : index
    %c0_27 = arith.constant 0 : index
    %65 = vector.load %arg3[%c112, %c0_27] : memref<224x128xf32, #tpu.memory_space<vmem>>, vector<1x5xf32>
    %cst_28 = arith.constant dense<0.000000e+00> : vector<16xf32>
    %66 = vector.multi_reduction <add>, %63, %cst_28 [1] : vector<16x5xf32> to vector<16xf32>
    %67 = vector.shape_cast %66 : vector<16xf32> to vector<16x1xf32>
    %cst_29 = arith.constant 5.000000e+00 : f32
    %68 = vector.broadcast %cst_29 : f32 to vector<16x1xf32>
    %69 = arith.divf %67, %68 : vector<16x1xf32>
    %70 = vector.broadcast %69 : vector<16x1xf32> to vector<16x5xf32>
    %71 = arith.subf %63, %70 : vector<16x5xf32>
    %72 = arith.mulf %71, %71 : vector<16x5xf32>
    %cst_30 = arith.constant dense<0.000000e+00> : vector<16xf32>
    %73 = vector.multi_reduction <add>, %72, %cst_30 [1] : vector<16x5xf32> to vector<16xf32>
    %74 = vector.shape_cast %73 : vector<16xf32> to vector<16x1xf32>
    %cst_31 = arith.constant 5.000000e+00 : f32
    %75 = vector.broadcast %cst_31 : f32 to vector<16x1xf32>
    %76 = arith.divf %74, %75 : vector<16x1xf32>
    %77 = vector.broadcast %69 : vector<16x1xf32> to vector<16x5xf32>
    %78 = arith.subf %63, %77 : vector<16x5xf32>
    %cst_32 = arith.constant 9.99999974E-6 : f32
    %79 = vector.broadcast %cst_32 : f32 to vector<16x1xf32>
    %80 = arith.addf %76, %79 : vector<16x1xf32>
    %81 = math.rsqrt %80 : vector<16x1xf32>
    %82 = vector.broadcast %81 : vector<16x1xf32> to vector<16x5xf32>
    %83 = arith.mulf %78, %82 : vector<16x5xf32>
    %84 = vector.broadcast %64 : vector<1x5xf32> to vector<16x5xf32>
    %85 = arith.mulf %83, %84 : vector<16x5xf32>
    %86 = vector.broadcast %65 : vector<1x5xf32> to vector<16x5xf32>
    %87 = arith.addf %85, %86 : vector<16x5xf32>
    %c120 = arith.constant 120 : index
    %c0_33 = arith.constant 0 : index
    %88 = vector.load %arg3[%c120, %c0_33] : memref<224x128xf32, #tpu.memory_space<vmem>>, vector<5x5xf32>
    %c128 = arith.constant 128 : index
    %c0_34 = arith.constant 0 : index
    %89 = vector.load %arg3[%c128, %c0_34] : memref<224x128xf32, #tpu.memory_space<vmem>>, vector<1x5xf32>
    %cst_35 = arith.constant dense<0.000000e+00> : vector<16x5xf32>
    %90 = tpu.matmul %9, %88, %cst_35 {dimension_numbers = #tpu.dot_dimension_numbers<[1], [0], [0], [1], [0, 0, 1, 1], [], []>} : vector<16x5xf32>, vector<5x5xf32>, vector<16x5xf32> -> vector<16x5xf32>
    %91 = math.tanh %90 : vector<16x5xf32>
    %92 = vector.broadcast %89 : vector<1x5xf32> to vector<16x5xf32>
    %93 = arith.mulf %91, %92 : vector<16x5xf32>
    %cst_36 = arith.constant dense<0.000000e+00> : vector<16xf32>
    %94 = vector.multi_reduction <add>, %93, %cst_36 [1] : vector<16x5xf32> to vector<16xf32>
    %95 = vector.shape_cast %94 : vector<16xf32> to vector<16x1xf32>
    %96 = tpu.iota {dimensions = array<i32: 0>} : vector<16x2xi32>
    %97 = tpu.iota {dimensions = array<i32: 1>} : vector<16x2xi32>
    %c8_i32 = arith.constant 8 : i32
    %98 = vector.broadcast %c8_i32 : i32 to vector<16x2xi32>
    %99 = arith.muli %97, %98 : vector<16x2xi32>
    %100 = arith.cmpi sge, %96, %99 : vector<16x2xi32>
    %c1_i32 = arith.constant 1 : i32
    %101 = vector.broadcast %c1_i32 : i32 to vector<16x2xi32>
    %102 = arith.addi %97, %101 : vector<16x2xi32>
    %c8_i32_37 = arith.constant 8 : i32
    %103 = vector.broadcast %c8_i32_37 : i32 to vector<16x2xi32>
    %104 = arith.muli %102, %103 : vector<16x2xi32>
    %105 = arith.cmpi slt, %96, %104 : vector<16x2xi32>
    %106 = arith.andi %100, %105 : vector<16x2xi1>
    %107 = arith.extui %106 : vector<16x2xi1> to vector<16x2xi32>
    %108 = arith.sitofp %107 : vector<16x2xi32> to vector<16x2xf32>
    %cst_38 = arith.constant 0xFF800000 : f32
    %109 = vector.shape_cast %95 : vector<16x1xf32> to vector<16x1xf32>
    %110 = vector.broadcast %109 : vector<16x1xf32> to vector<16x2xf32>
    %111 = vector.broadcast %cst_38 : f32 to vector<16x2xf32>
    %112 = arith.select %106, %110, %111 : vector<16x2xi1>, vector<16x2xf32>
    %cst_39 = arith.constant dense<0xFF800000> : vector<2xf32>
    %113 = vector.multi_reduction <maximumf>, %112, %cst_39 [0] : vector<16x2xf32> to vector<2xf32>
    %114 = vector.shape_cast %113 : vector<2xf32> to vector<1x2xf32>
    %115 = vector.broadcast %114 : vector<1x2xf32> to vector<16x2xf32>
    %116 = arith.mulf %108, %115 : vector<16x2xf32>
    %cst_40 = arith.constant dense<0.000000e+00> : vector<16xf32>
    %117 = vector.multi_reduction <add>, %116, %cst_40 [1] : vector<16x2xf32> to vector<16xf32>
    %118 = vector.shape_cast %117 : vector<16xf32> to vector<16x1xf32>
    %119 = arith.subf %95, %118 : vector<16x1xf32>
    %120 = math.exp %119 : vector<16x1xf32>
    %121 = vector.broadcast %120 : vector<16x1xf32> to vector<16x2xf32>
    %122 = arith.mulf %108, %121 : vector<16x2xf32>
    %cst_41 = arith.constant dense<0.000000e+00> : vector<2xf32>
    %123 = vector.multi_reduction <add>, %122, %cst_41 [0] : vector<16x2xf32> to vector<2xf32>
    %124 = vector.shape_cast %123 : vector<2xf32> to vector<1x2xf32>
    %125 = vector.broadcast %124 : vector<1x2xf32> to vector<16x2xf32>
    %126 = arith.mulf %108, %125 : vector<16x2xf32>
    %cst_42 = arith.constant dense<0.000000e+00> : vector<16xf32>
    %127 = vector.multi_reduction <add>, %126, %cst_42 [1] : vector<16x2xf32> to vector<16xf32>
    %128 = vector.shape_cast %127 : vector<16xf32> to vector<16x1xf32>
    %129 = arith.divf %120, %128 : vector<16x1xf32>
    %130 = tpu.iota {dimensions = array<i32: 1>} : vector<2x16xi32>
    %131 = tpu.iota {dimensions = array<i32: 0>} : vector<2x16xi32>
    %c8_i32_43 = arith.constant 8 : i32
    %132 = vector.broadcast %c8_i32_43 : i32 to vector<2x16xi32>
    %133 = arith.muli %131, %132 : vector<2x16xi32>
    %134 = arith.cmpi sge, %130, %133 : vector<2x16xi32>
    %c1_i32_44 = arith.constant 1 : i32
    %135 = vector.broadcast %c1_i32_44 : i32 to vector<2x16xi32>
    %136 = arith.addi %131, %135 : vector<2x16xi32>
    %c8_i32_45 = arith.constant 8 : i32
    %137 = vector.broadcast %c8_i32_45 : i32 to vector<2x16xi32>
    %138 = arith.muli %136, %137 : vector<2x16xi32>
    %139 = arith.cmpi slt, %130, %138 : vector<2x16xi32>
    %140 = arith.andi %134, %139 : vector<2x16xi1>
    %141 = arith.extui %140 : vector<2x16xi1> to vector<2x16xi32>
    %142 = arith.sitofp %141 : vector<2x16xi32> to vector<2x16xf32>
    %143 = vector.broadcast %129 : vector<16x1xf32> to vector<16x5xf32>
    %144 = arith.mulf %143, %9 : vector<16x5xf32>
    %cst_46 = arith.constant dense<0.000000e+00> : vector<2x5xf32>
    %145 = tpu.matmul %142, %144, %cst_46 {dimension_numbers = #tpu.dot_dimension_numbers<[1], [0], [0], [1], [0, 0, 1, 1], [], []>} : vector<2x16xf32>, vector<16x5xf32>, vector<2x5xf32> -> vector<2x5xf32>
    %c0_47 = arith.constant 0 : index
    %c0_48 = arith.constant 0 : index
    %146 = vector.load %arg2[%c0_47, %c0_48] : memref<20x8xf32, #tpu.memory_space<vmem>>, vector<20x8xf32>
    %c152 = arith.constant 152 : index
    %c0_49 = arith.constant 0 : index
    %147 = vector.load %arg3[%c152, %c0_49] : memref<224x128xf32, #tpu.memory_space<vmem>>, vector<8x5xf32>
    %cst_50 = arith.constant dense<0.000000e+00> : vector<20x5xf32>
    %148 = tpu.matmul %146, %147, %cst_50 {dimension_numbers = #tpu.dot_dimension_numbers<[1], [0], [0], [1], [0, 0, 1, 1], [], []>} : vector<20x8xf32>, vector<8x5xf32>, vector<20x5xf32> -> vector<20x5xf32>
    %c160 = arith.constant 160 : index
    %c0_51 = arith.constant 0 : index
    %149 = vector.load %arg3[%c160, %c0_51] : memref<224x128xf32, #tpu.memory_space<vmem>>, vector<1x5xf32>
    %150 = vector.broadcast %149 : vector<1x5xf32> to vector<20x5xf32>
    %151 = arith.addf %148, %150 : vector<20x5xf32>
    %cst_52 = arith.constant 0.000000e+00 : f32
    %152 = vector.broadcast %cst_52 : f32 to vector<20x5xf32>
    %153 = arith.maximumf %151, %152 : vector<20x5xf32>
    %c176 = arith.constant 176 : index
    %c0_53 = arith.constant 0 : index
    %154 = vector.load %arg3[%c176, %c0_53] : memref<224x128xf32, #tpu.memory_space<vmem>>, vector<5x10xf32>
    %cst_54 = arith.constant dense<0.000000e+00> : vector<20x10xf32>
    %155 = tpu.matmul %153, %154, %cst_54 {dimension_numbers = #tpu.dot_dimension_numbers<[1], [0], [0], [1], [0, 0, 1, 1], [], []>} : vector<20x5xf32>, vector<5x10xf32>, vector<20x10xf32> -> vector<20x10xf32>
    %c184 = arith.constant 184 : index
    %c0_55 = arith.constant 0 : index
    %156 = vector.load %arg3[%c184, %c0_55] : memref<224x128xf32, #tpu.memory_space<vmem>>, vector<1x10xf32>
    %157 = vector.broadcast %156 : vector<1x10xf32> to vector<20x10xf32>
    %158 = arith.addf %155, %157 : vector<20x10xf32>
    %c136 = arith.constant 136 : index
    %c0_56 = arith.constant 0 : index
    %159 = vector.load %arg3[%c136, %c0_56] : memref<224x128xf32, #tpu.memory_space<vmem>>, vector<5x5xf32>
    %c144 = arith.constant 144 : index
    %c0_57 = arith.constant 0 : index
    %160 = vector.load %arg3[%c144, %c0_57] : memref<224x128xf32, #tpu.memory_space<vmem>>, vector<1x5xf32>
    %cst_58 = arith.constant dense<0.000000e+00> : vector<16x5xf32>
    %161 = tpu.matmul %87, %159, %cst_58 {dimension_numbers = #tpu.dot_dimension_numbers<[1], [0], [0], [1], [0, 0, 1, 1], [], []>} : vector<16x5xf32>, vector<5x5xf32>, vector<16x5xf32> -> vector<16x5xf32>
    %162 = math.tanh %161 : vector<16x5xf32>
    %163 = vector.broadcast %160 : vector<1x5xf32> to vector<16x5xf32>
    %164 = arith.mulf %162, %163 : vector<16x5xf32>
    %cst_59 = arith.constant dense<0.000000e+00> : vector<16xf32>
    %165 = vector.multi_reduction <add>, %164, %cst_59 [1] : vector<16x5xf32> to vector<16xf32>
    %166 = vector.shape_cast %165 : vector<16xf32> to vector<16x1xf32>
    %167 = tpu.iota {dimensions = array<i32: 0>} : vector<16x2xi32>
    %168 = tpu.iota {dimensions = array<i32: 1>} : vector<16x2xi32>
    %c8_i32_60 = arith.constant 8 : i32
    %169 = vector.broadcast %c8_i32_60 : i32 to vector<16x2xi32>
    %170 = arith.muli %168, %169 : vector<16x2xi32>
    %171 = arith.cmpi sge, %167, %170 : vector<16x2xi32>
    %c1_i32_61 = arith.constant 1 : i32
    %172 = vector.broadcast %c1_i32_61 : i32 to vector<16x2xi32>
    %173 = arith.addi %168, %172 : vector<16x2xi32>
    %c8_i32_62 = arith.constant 8 : i32
    %174 = vector.broadcast %c8_i32_62 : i32 to vector<16x2xi32>
    %175 = arith.muli %173, %174 : vector<16x2xi32>
    %176 = arith.cmpi slt, %167, %175 : vector<16x2xi32>
    %177 = arith.andi %171, %176 : vector<16x2xi1>
    %178 = arith.extui %177 : vector<16x2xi1> to vector<16x2xi32>
    %179 = arith.sitofp %178 : vector<16x2xi32> to vector<16x2xf32>
    %cst_63 = arith.constant 0xFF800000 : f32
    %180 = vector.shape_cast %166 : vector<16x1xf32> to vector<16x1xf32>
    %181 = vector.broadcast %180 : vector<16x1xf32> to vector<16x2xf32>
    %182 = vector.broadcast %cst_63 : f32 to vector<16x2xf32>
    %183 = arith.select %177, %181, %182 : vector<16x2xi1>, vector<16x2xf32>
    %cst_64 = arith.constant dense<0xFF800000> : vector<2xf32>
    %184 = vector.multi_reduction <maximumf>, %183, %cst_64 [0] : vector<16x2xf32> to vector<2xf32>
    %185 = vector.shape_cast %184 : vector<2xf32> to vector<1x2xf32>
    %186 = vector.broadcast %185 : vector<1x2xf32> to vector<16x2xf32>
    %187 = arith.mulf %179, %186 : vector<16x2xf32>
    %cst_65 = arith.constant dense<0.000000e+00> : vector<16xf32>
    %188 = vector.multi_reduction <add>, %187, %cst_65 [1] : vector<16x2xf32> to vector<16xf32>
    %189 = vector.shape_cast %188 : vector<16xf32> to vector<16x1xf32>
    %190 = arith.subf %166, %189 : vector<16x1xf32>
    %191 = math.exp %190 : vector<16x1xf32>
    %192 = vector.broadcast %191 : vector<16x1xf32> to vector<16x2xf32>
    %193 = arith.mulf %179, %192 : vector<16x2xf32>
    %cst_66 = arith.constant dense<0.000000e+00> : vector<2xf32>
    %194 = vector.multi_reduction <add>, %193, %cst_66 [0] : vector<16x2xf32> to vector<2xf32>
    %195 = vector.shape_cast %194 : vector<2xf32> to vector<1x2xf32>
    %196 = vector.broadcast %195 : vector<1x2xf32> to vector<16x2xf32>
    %197 = arith.mulf %179, %196 : vector<16x2xf32>
    %cst_67 = arith.constant dense<0.000000e+00> : vector<16xf32>
    %198 = vector.multi_reduction <add>, %197, %cst_67 [1] : vector<16x2xf32> to vector<16xf32>
    %199 = vector.shape_cast %198 : vector<16xf32> to vector<16x1xf32>
    %200 = arith.divf %191, %199 : vector<16x1xf32>
    %201 = tpu.iota {dimensions = array<i32: 1>} : vector<2x16xi32>
    %202 = tpu.iota {dimensions = array<i32: 0>} : vector<2x16xi32>
    %c8_i32_68 = arith.constant 8 : i32
    %203 = vector.broadcast %c8_i32_68 : i32 to vector<2x16xi32>
    %204 = arith.muli %202, %203 : vector<2x16xi32>
    %205 = arith.cmpi sge, %201, %204 : vector<2x16xi32>
    %c1_i32_69 = arith.constant 1 : i32
    %206 = vector.broadcast %c1_i32_69 : i32 to vector<2x16xi32>
    %207 = arith.addi %202, %206 : vector<2x16xi32>
    %c8_i32_70 = arith.constant 8 : i32
    %208 = vector.broadcast %c8_i32_70 : i32 to vector<2x16xi32>
    %209 = arith.muli %207, %208 : vector<2x16xi32>
    %210 = arith.cmpi slt, %201, %209 : vector<2x16xi32>
    %211 = arith.andi %205, %210 : vector<2x16xi1>
    %212 = arith.extui %211 : vector<2x16xi1> to vector<2x16xi32>
    %213 = arith.sitofp %212 : vector<2x16xi32> to vector<2x16xf32>
    %214 = vector.broadcast %200 : vector<16x1xf32> to vector<16x5xf32>
    %215 = arith.mulf %214, %87 : vector<16x5xf32>
    %cst_71 = arith.constant dense<0.000000e+00> : vector<2x5xf32>
    %216 = tpu.matmul %213, %215, %cst_71 {dimension_numbers = #tpu.dot_dimension_numbers<[1], [0], [0], [1], [0, 0, 1, 1], [], []>} : vector<2x16xf32>, vector<16x5xf32>, vector<2x5xf32> -> vector<2x5xf32>
    %c168 = arith.constant 168 : index
    %c0_72 = arith.constant 0 : index
    %217 = vector.load %arg3[%c168, %c0_72] : memref<224x128xf32, #tpu.memory_space<vmem>>, vector<5x10xf32>
    %c192 = arith.constant 192 : index
    %c0_73 = arith.constant 0 : index
    %218 = vector.load %arg3[%c192, %c0_73] : memref<224x128xf32, #tpu.memory_space<vmem>>, vector<5x5xf32>
    %c200 = arith.constant 200 : index
    %c0_74 = arith.constant 0 : index
    %219 = vector.load %arg3[%c200, %c0_74] : memref<224x128xf32, #tpu.memory_space<vmem>>, vector<1x5xf32>
    %c208 = arith.constant 208 : index
    %c0_75 = arith.constant 0 : index
    %220 = vector.load %arg3[%c208, %c0_75] : memref<224x128xf32, #tpu.memory_space<vmem>>, vector<1x5xf32>
    %c216 = arith.constant 216 : index
    %c0_76 = arith.constant 0 : index
    %221 = vector.load %arg3[%c216, %c0_76] : memref<224x128xf32, #tpu.memory_space<vmem>>, vector<1x5xf32>
    %cst_77 = arith.constant dense<0.000000e+00> : vector<2x10xf32>
    %222 = tpu.matmul %216, %217, %cst_77 {dimension_numbers = #tpu.dot_dimension_numbers<[1], [0], [0], [1], [0, 0, 1, 1], [], []>} : vector<2x5xf32>, vector<5x10xf32>, vector<2x10xf32> -> vector<2x10xf32>
    %223 = vector.extract_strided_slice %158 {offsets = [0, 0], sizes = [2, 10], strides = [1, 1]} : vector<20x10xf32> to vector<2x10xf32>
    %224 = arith.addf %222, %223 : vector<2x10xf32>
    %225 = vector.extract_strided_slice %224 {offsets = [0, 0], sizes = [2, 5], strides = [1, 1]} : vector<2x10xf32> to vector<2x5xf32>
    %cst_78 = arith.constant 0.000000e+00 : f32
    %226 = vector.broadcast %cst_78 : f32 to vector<2x5xf32>
    %227 = arith.maximumf %225, %226 : vector<2x5xf32>
    %228 = vector.extract_strided_slice %224 {offsets = [0, 5], sizes = [2, 5], strides = [1, 1]} : vector<2x10xf32> to vector<2x5xf32>
    %cst_79 = arith.constant dense<0.000000e+00> : vector<2x5xf32>
    %229 = tpu.matmul %227, %218, %cst_79 {dimension_numbers = #tpu.dot_dimension_numbers<[1], [0], [0], [1], [0, 0, 1, 1], [], []>} : vector<2x5xf32>, vector<5x5xf32>, vector<2x5xf32> -> vector<2x5xf32>
    %230 = vector.broadcast %219 : vector<1x5xf32> to vector<2x5xf32>
    %231 = arith.addf %229, %230 : vector<2x5xf32>
    %232 = arith.addf %231, %228 : vector<2x5xf32>
    %cst_80 = arith.constant dense<0.000000e+00> : vector<2xf32>
    %233 = vector.multi_reduction <add>, %232, %cst_80 [1] : vector<2x5xf32> to vector<2xf32>
    %234 = vector.shape_cast %233 : vector<2xf32> to vector<2x1xf32>
    %cst_81 = arith.constant 5.000000e+00 : f32
    %235 = vector.broadcast %cst_81 : f32 to vector<2x1xf32>
    %236 = arith.divf %234, %235 : vector<2x1xf32>
    %237 = vector.broadcast %236 : vector<2x1xf32> to vector<2x5xf32>
    %238 = arith.subf %232, %237 : vector<2x5xf32>
    %239 = arith.mulf %238, %238 : vector<2x5xf32>
    %cst_82 = arith.constant dense<0.000000e+00> : vector<2xf32>
    %240 = vector.multi_reduction <add>, %239, %cst_82 [1] : vector<2x5xf32> to vector<2xf32>
    %241 = vector.shape_cast %240 : vector<2xf32> to vector<2x1xf32>
    %cst_83 = arith.constant 5.000000e+00 : f32
    %242 = vector.broadcast %cst_83 : f32 to vector<2x1xf32>
    %243 = arith.divf %241, %242 : vector<2x1xf32>
    %244 = vector.broadcast %236 : vector<2x1xf32> to vector<2x5xf32>
    %245 = arith.subf %232, %244 : vector<2x5xf32>
    %cst_84 = arith.constant 9.99999974E-6 : f32
    %246 = vector.broadcast %cst_84 : f32 to vector<2x1xf32>
    %247 = arith.addf %243, %246 : vector<2x1xf32>
    %248 = math.rsqrt %247 : vector<2x1xf32>
    %249 = vector.broadcast %248 : vector<2x1xf32> to vector<2x5xf32>
    %250 = arith.mulf %245, %249 : vector<2x5xf32>
    %251 = vector.broadcast %220 : vector<1x5xf32> to vector<2x5xf32>
    %252 = arith.mulf %250, %251 : vector<2x5xf32>
    %253 = vector.broadcast %221 : vector<1x5xf32> to vector<2x5xf32>
    %254 = arith.addf %252, %253 : vector<2x5xf32>
    %255 = arith.addf %254, %145 : vector<2x5xf32>
    %c0_85 = arith.constant 0 : index
    %c0_86 = arith.constant 0 : index
    %256 = vector.load %arg4[%c0_85, %c0_86] : memref<20x5xf32, #tpu.memory_space<vmem>>, vector<2x5xf32>
    tpu.vector_store %arg4[%c0_85, %c0_86], %255 {strides = array<i32>} : memref<20x5xf32, #tpu.memory_space<vmem>>, vector<2x5xf32>,
    %cst_87 = arith.constant dense<0.000000e+00> : vector<2x10xf32>
    %257 = tpu.matmul %254, %217, %cst_87 {dimension_numbers = #tpu.dot_dimension_numbers<[1], [0], [0], [1], [0, 0, 1, 1], [], []>} : vector<2x5xf32>, vector<5x10xf32>, vector<2x10xf32> -> vector<2x10xf32>
    %258 = vector.extract_strided_slice %158 {offsets = [2, 0], sizes = [2, 10], strides = [1, 1]} : vector<20x10xf32> to vector<2x10xf32>
    %259 = arith.addf %257, %258 : vector<2x10xf32>
    %260 = vector.extract_strided_slice %259 {offsets = [0, 0], sizes = [2, 5], strides = [1, 1]} : vector<2x10xf32> to vector<2x5xf32>
    %cst_88 = arith.constant 0.000000e+00 : f32
    %261 = vector.broadcast %cst_88 : f32 to vector<2x5xf32>
    %262 = arith.maximumf %260, %261 : vector<2x5xf32>
    %263 = vector.extract_strided_slice %259 {offsets = [0, 5], sizes = [2, 5], strides = [1, 1]} : vector<2x10xf32> to vector<2x5xf32>
    %cst_89 = arith.constant dense<0.000000e+00> : vector<2x5xf32>
    %264 = tpu.matmul %262, %218, %cst_89 {dimension_numbers = #tpu.dot_dimension_numbers<[1], [0], [0], [1], [0, 0, 1, 1], [], []>} : vector<2x5xf32>, vector<5x5xf32>, vector<2x5xf32> -> vector<2x5xf32>
    %265 = vector.broadcast %219 : vector<1x5xf32> to vector<2x5xf32>
    %266 = arith.addf %264, %265 : vector<2x5xf32>
    %267 = arith.addf %266, %263 : vector<2x5xf32>
    %cst_90 = arith.constant dense<0.000000e+00> : vector<2xf32>
    %268 = vector.multi_reduction <add>, %267, %cst_90 [1] : vector<2x5xf32> to vector<2xf32>
    %269 = vector.shape_cast %268 : vector<2xf32> to vector<2x1xf32>
    %cst_91 = arith.constant 5.000000e+00 : f32
    %270 = vector.broadcast %cst_91 : f32 to vector<2x1xf32>
    %271 = arith.divf %269, %270 : vector<2x1xf32>
    %272 = vector.broadcast %271 : vector<2x1xf32> to vector<2x5xf32>
    %273 = arith.subf %267, %272 : vector<2x5xf32>
    %274 = arith.mulf %273, %273 : vector<2x5xf32>
    %cst_92 = arith.constant dense<0.000000e+00> : vector<2xf32>
    %275 = vector.multi_reduction <add>, %274, %cst_92 [1] : vector<2x5xf32> to vector<2xf32>
    %276 = vector.shape_cast %275 : vector<2xf32> to vector<2x1xf32>
    %cst_93 = arith.constant 5.000000e+00 : f32
    %277 = vector.broadcast %cst_93 : f32 to vector<2x1xf32>
    %278 = arith.divf %276, %277 : vector<2x1xf32>
    %279 = vector.broadcast %271 : vector<2x1xf32> to vector<2x5xf32>
    %280 = arith.subf %267, %279 : vector<2x5xf32>
    %cst_94 = arith.constant 9.99999974E-6 : f32
    %281 = vector.broadcast %cst_94 : f32 to vector<2x1xf32>
    %282 = arith.addf %278, %281 : vector<2x1xf32>
    %283 = math.rsqrt %282 : vector<2x1xf32>
    %284 = vector.broadcast %283 : vector<2x1xf32> to vector<2x5xf32>
    %285 = arith.mulf %280, %284 : vector<2x5xf32>
    %286 = vector.broadcast %220 : vector<1x5xf32> to vector<2x5xf32>
    %287 = arith.mulf %285, %286 : vector<2x5xf32>
    %288 = vector.broadcast %221 : vector<1x5xf32> to vector<2x5xf32>
    %289 = arith.addf %287, %288 : vector<2x5xf32>
    %290 = arith.addf %289, %145 : vector<2x5xf32>
    %c2 = arith.constant 2 : index
    %c0_95 = arith.constant 0 : index
    %291 = vector.load %arg4[%c2, %c0_95] : memref<20x5xf32, #tpu.memory_space<vmem>>, vector<2x5xf32>
    tpu.vector_store %arg4[%c2, %c0_95], %290 {strides = array<i32>} : memref<20x5xf32, #tpu.memory_space<vmem>>, vector<2x5xf32>,
    %cst_96 = arith.constant dense<0.000000e+00> : vector<2x10xf32>
    %292 = tpu.matmul %289, %217, %cst_96 {dimension_numbers = #tpu.dot_dimension_numbers<[1], [0], [0], [1], [0, 0, 1, 1], [], []>} : vector<2x5xf32>, vector<5x10xf32>, vector<2x10xf32> -> vector<2x10xf32>
    %293 = vector.extract_strided_slice %158 {offsets = [4, 0], sizes = [2, 10], strides = [1, 1]} : vector<20x10xf32> to vector<2x10xf32>
    %294 = arith.addf %292, %293 : vector<2x10xf32>
    %295 = vector.extract_strided_slice %294 {offsets = [0, 0], sizes = [2, 5], strides = [1, 1]} : vector<2x10xf32> to vector<2x5xf32>
    %cst_97 = arith.constant 0.000000e+00 : f32
    %296 = vector.broadcast %cst_97 : f32 to vector<2x5xf32>
    %297 = arith.maximumf %295, %296 : vector<2x5xf32>
    %298 = vector.extract_strided_slice %294 {offsets = [0, 5], sizes = [2, 5], strides = [1, 1]} : vector<2x10xf32> to vector<2x5xf32>
    %cst_98 = arith.constant dense<0.000000e+00> : vector<2x5xf32>
    %299 = tpu.matmul %297, %218, %cst_98 {dimension_numbers = #tpu.dot_dimension_numbers<[1], [0], [0], [1], [0, 0, 1, 1], [], []>} : vector<2x5xf32>, vector<5x5xf32>, vector<2x5xf32> -> vector<2x5xf32>
    %300 = vector.broadcast %219 : vector<1x5xf32> to vector<2x5xf32>
    %301 = arith.addf %299, %300 : vector<2x5xf32>
    %302 = arith.addf %301, %298 : vector<2x5xf32>
    %cst_99 = arith.constant dense<0.000000e+00> : vector<2xf32>
    %303 = vector.multi_reduction <add>, %302, %cst_99 [1] : vector<2x5xf32> to vector<2xf32>
    %304 = vector.shape_cast %303 : vector<2xf32> to vector<2x1xf32>
    %cst_100 = arith.constant 5.000000e+00 : f32
    %305 = vector.broadcast %cst_100 : f32 to vector<2x1xf32>
    %306 = arith.divf %304, %305 : vector<2x1xf32>
    %307 = vector.broadcast %306 : vector<2x1xf32> to vector<2x5xf32>
    %308 = arith.subf %302, %307 : vector<2x5xf32>
    %309 = arith.mulf %308, %308 : vector<2x5xf32>
    %cst_101 = arith.constant dense<0.000000e+00> : vector<2xf32>
    %310 = vector.multi_reduction <add>, %309, %cst_101 [1] : vector<2x5xf32> to vector<2xf32>
    %311 = vector.shape_cast %310 : vector<2xf32> to vector<2x1xf32>
    %cst_102 = arith.constant 5.000000e+00 : f32
    %312 = vector.broadcast %cst_102 : f32 to vector<2x1xf32>
    %313 = arith.divf %311, %312 : vector<2x1xf32>
    %314 = vector.broadcast %306 : vector<2x1xf32> to vector<2x5xf32>
    %315 = arith.subf %302, %314 : vector<2x5xf32>
    %cst_103 = arith.constant 9.99999974E-6 : f32
    %316 = vector.broadcast %cst_103 : f32 to vector<2x1xf32>
    %317 = arith.addf %313, %316 : vector<2x1xf32>
    %318 = math.rsqrt %317 : vector<2x1xf32>
    %319 = vector.broadcast %318 : vector<2x1xf32> to vector<2x5xf32>
    %320 = arith.mulf %315, %319 : vector<2x5xf32>
    %321 = vector.broadcast %220 : vector<1x5xf32> to vector<2x5xf32>
    %322 = arith.mulf %320, %321 : vector<2x5xf32>
    %323 = vector.broadcast %221 : vector<1x5xf32> to vector<2x5xf32>
    %324 = arith.addf %322, %323 : vector<2x5xf32>
    %325 = arith.addf %324, %145 : vector<2x5xf32>
    %c4 = arith.constant 4 : index
    %c0_104 = arith.constant 0 : index
    %326 = vector.load %arg4[%c4, %c0_104] : memref<20x5xf32, #tpu.memory_space<vmem>>, vector<2x5xf32>
    tpu.vector_store %arg4[%c4, %c0_104], %325 {strides = array<i32>} : memref<20x5xf32, #tpu.memory_space<vmem>>, vector<2x5xf32>,
    %cst_105 = arith.constant dense<0.000000e+00> : vector<2x10xf32>
    %327 = tpu.matmul %324, %217, %cst_105 {dimension_numbers = #tpu.dot_dimension_numbers<[1], [0], [0], [1], [0, 0, 1, 1], [], []>} : vector<2x5xf32>, vector<5x10xf32>, vector<2x10xf32> -> vector<2x10xf32>
    %328 = vector.extract_strided_slice %158 {offsets = [6, 0], sizes = [2, 10], strides = [1, 1]} : vector<20x10xf32> to vector<2x10xf32>
    %329 = arith.addf %327, %328 : vector<2x10xf32>
    %330 = vector.extract_strided_slice %329 {offsets = [0, 0], sizes = [2, 5], strides = [1, 1]} : vector<2x10xf32> to vector<2x5xf32>
    %cst_106 = arith.constant 0.000000e+00 : f32
    %331 = vector.broadcast %cst_106 : f32 to vector<2x5xf32>
    %332 = arith.maximumf %330, %331 : vector<2x5xf32>
    %333 = vector.extract_strided_slice %329 {offsets = [0, 5], sizes = [2, 5], strides = [1, 1]} : vector<2x10xf32> to vector<2x5xf32>
    %cst_107 = arith.constant dense<0.000000e+00> : vector<2x5xf32>
    %334 = tpu.matmul %332, %218, %cst_107 {dimension_numbers = #tpu.dot_dimension_numbers<[1], [0], [0], [1], [0, 0, 1, 1], [], []>} : vector<2x5xf32>, vector<5x5xf32>, vector<2x5xf32> -> vector<2x5xf32>
    %335 = vector.broadcast %219 : vector<1x5xf32> to vector<2x5xf32>
    %336 = arith.addf %334, %335 : vector<2x5xf32>
    %337 = arith.addf %336, %333 : vector<2x5xf32>
    %cst_108 = arith.constant dense<0.000000e+00> : vector<2xf32>
    %338 = vector.multi_reduction <add>, %337, %cst_108 [1] : vector<2x5xf32> to vector<2xf32>
    %339 = vector.shape_cast %338 : vector<2xf32> to vector<2x1xf32>
    %cst_109 = arith.constant 5.000000e+00 : f32
    %340 = vector.broadcast %cst_109 : f32 to vector<2x1xf32>
    %341 = arith.divf %339, %340 : vector<2x1xf32>
    %342 = vector.broadcast %341 : vector<2x1xf32> to vector<2x5xf32>
    %343 = arith.subf %337, %342 : vector<2x5xf32>
    %344 = arith.mulf %343, %343 : vector<2x5xf32>
    %cst_110 = arith.constant dense<0.000000e+00> : vector<2xf32>
    %345 = vector.multi_reduction <add>, %344, %cst_110 [1] : vector<2x5xf32> to vector<2xf32>
    %346 = vector.shape_cast %345 : vector<2xf32> to vector<2x1xf32>
    %cst_111 = arith.constant 5.000000e+00 : f32
    %347 = vector.broadcast %cst_111 : f32 to vector<2x1xf32>
    %348 = arith.divf %346, %347 : vector<2x1xf32>
    %349 = vector.broadcast %341 : vector<2x1xf32> to vector<2x5xf32>
    %350 = arith.subf %337, %349 : vector<2x5xf32>
    %cst_112 = arith.constant 9.99999974E-6 : f32
    %351 = vector.broadcast %cst_112 : f32 to vector<2x1xf32>
    %352 = arith.addf %348, %351 : vector<2x1xf32>
    %353 = math.rsqrt %352 : vector<2x1xf32>
    %354 = vector.broadcast %353 : vector<2x1xf32> to vector<2x5xf32>
    %355 = arith.mulf %350, %354 : vector<2x5xf32>
    %356 = vector.broadcast %220 : vector<1x5xf32> to vector<2x5xf32>
    %357 = arith.mulf %355, %356 : vector<2x5xf32>
    %358 = vector.broadcast %221 : vector<1x5xf32> to vector<2x5xf32>
    %359 = arith.addf %357, %358 : vector<2x5xf32>
    %360 = arith.addf %359, %145 : vector<2x5xf32>
    %c6 = arith.constant 6 : index
    %c0_113 = arith.constant 0 : index
    %361 = vector.load %arg4[%c6, %c0_113] : memref<20x5xf32, #tpu.memory_space<vmem>>, vector<2x5xf32>
    tpu.vector_store %arg4[%c6, %c0_113], %360 {strides = array<i32>} : memref<20x5xf32, #tpu.memory_space<vmem>>, vector<2x5xf32>,
    %cst_114 = arith.constant dense<0.000000e+00> : vector<2x10xf32>
    %362 = tpu.matmul %359, %217, %cst_114 {dimension_numbers = #tpu.dot_dimension_numbers<[1], [0], [0], [1], [0, 0, 1, 1], [], []>} : vector<2x5xf32>, vector<5x10xf32>, vector<2x10xf32> -> vector<2x10xf32>
    %363 = vector.extract_strided_slice %158 {offsets = [8, 0], sizes = [2, 10], strides = [1, 1]} : vector<20x10xf32> to vector<2x10xf32>
    %364 = arith.addf %362, %363 : vector<2x10xf32>
    %365 = vector.extract_strided_slice %364 {offsets = [0, 0], sizes = [2, 5], strides = [1, 1]} : vector<2x10xf32> to vector<2x5xf32>
    %cst_115 = arith.constant 0.000000e+00 : f32
    %366 = vector.broadcast %cst_115 : f32 to vector<2x5xf32>
    %367 = arith.maximumf %365, %366 : vector<2x5xf32>
    %368 = vector.extract_strided_slice %364 {offsets = [0, 5], sizes = [2, 5], strides = [1, 1]} : vector<2x10xf32> to vector<2x5xf32>
    %cst_116 = arith.constant dense<0.000000e+00> : vector<2x5xf32>
    %369 = tpu.matmul %367, %218, %cst_116 {dimension_numbers = #tpu.dot_dimension_numbers<[1], [0], [0], [1], [0, 0, 1, 1], [], []>} : vector<2x5xf32>, vector<5x5xf32>, vector<2x5xf32> -> vector<2x5xf32>
    %370 = vector.broadcast %219 : vector<1x5xf32> to vector<2x5xf32>
    %371 = arith.addf %369, %370 : vector<2x5xf32>
    %372 = arith.addf %371, %368 : vector<2x5xf32>
    %cst_117 = arith.constant dense<0.000000e+00> : vector<2xf32>
    %373 = vector.multi_reduction <add>, %372, %cst_117 [1] : vector<2x5xf32> to vector<2xf32>
    %374 = vector.shape_cast %373 : vector<2xf32> to vector<2x1xf32>
    %cst_118 = arith.constant 5.000000e+00 : f32
    %375 = vector.broadcast %cst_118 : f32 to vector<2x1xf32>
    %376 = arith.divf %374, %375 : vector<2x1xf32>
    %377 = vector.broadcast %376 : vector<2x1xf32> to vector<2x5xf32>
    %378 = arith.subf %372, %377 : vector<2x5xf32>
    %379 = arith.mulf %378, %378 : vector<2x5xf32>
    %cst_119 = arith.constant dense<0.000000e+00> : vector<2xf32>
    %380 = vector.multi_reduction <add>, %379, %cst_119 [1] : vector<2x5xf32> to vector<2xf32>
    %381 = vector.shape_cast %380 : vector<2xf32> to vector<2x1xf32>
    %cst_120 = arith.constant 5.000000e+00 : f32
    %382 = vector.broadcast %cst_120 : f32 to vector<2x1xf32>
    %383 = arith.divf %381, %382 : vector<2x1xf32>
    %384 = vector.broadcast %376 : vector<2x1xf32> to vector<2x5xf32>
    %385 = arith.subf %372, %384 : vector<2x5xf32>
    %cst_121 = arith.constant 9.99999974E-6 : f32
    %386 = vector.broadcast %cst_121 : f32 to vector<2x1xf32>
    %387 = arith.addf %383, %386 : vector<2x1xf32>
    %388 = math.rsqrt %387 : vector<2x1xf32>
    %389 = vector.broadcast %388 : vector<2x1xf32> to vector<2x5xf32>
    %390 = arith.mulf %385, %389 : vector<2x5xf32>
    %391 = vector.broadcast %220 : vector<1x5xf32> to vector<2x5xf32>
    %392 = arith.mulf %390, %391 : vector<2x5xf32>
    %393 = vector.broadcast %221 : vector<1x5xf32> to vector<2x5xf32>
    %394 = arith.addf %392, %393 : vector<2x5xf32>
    %395 = arith.addf %394, %145 : vector<2x5xf32>
    %c8_122 = arith.constant 8 : index
    %c0_123 = arith.constant 0 : index
    %396 = vector.load %arg4[%c8_122, %c0_123] : memref<20x5xf32, #tpu.memory_space<vmem>>, vector<2x5xf32>
    tpu.vector_store %arg4[%c8_122, %c0_123], %395 {strides = array<i32>} : memref<20x5xf32, #tpu.memory_space<vmem>>, vector<2x5xf32>,
    %cst_124 = arith.constant dense<0.000000e+00> : vector<2x10xf32>
    %397 = tpu.matmul %394, %217, %cst_124 {dimension_numbers = #tpu.dot_dimension_numbers<[1], [0], [0], [1], [0, 0, 1, 1], [], []>} : vector<2x5xf32>, vector<5x10xf32>, vector<2x10xf32> -> vector<2x10xf32>
    %398 = vector.extract_strided_slice %158 {offsets = [10, 0], sizes = [2, 10], strides = [1, 1]} : vector<20x10xf32> to vector<2x10xf32>
    %399 = arith.addf %397, %398 : vector<2x10xf32>
    %400 = vector.extract_strided_slice %399 {offsets = [0, 0], sizes = [2, 5], strides = [1, 1]} : vector<2x10xf32> to vector<2x5xf32>
    %cst_125 = arith.constant 0.000000e+00 : f32
    %401 = vector.broadcast %cst_125 : f32 to vector<2x5xf32>
    %402 = arith.maximumf %400, %401 : vector<2x5xf32>
    %403 = vector.extract_strided_slice %399 {offsets = [0, 5], sizes = [2, 5], strides = [1, 1]} : vector<2x10xf32> to vector<2x5xf32>
    %cst_126 = arith.constant dense<0.000000e+00> : vector<2x5xf32>
    %404 = tpu.matmul %402, %218, %cst_126 {dimension_numbers = #tpu.dot_dimension_numbers<[1], [0], [0], [1], [0, 0, 1, 1], [], []>} : vector<2x5xf32>, vector<5x5xf32>, vector<2x5xf32> -> vector<2x5xf32>
    %405 = vector.broadcast %219 : vector<1x5xf32> to vector<2x5xf32>
    %406 = arith.addf %404, %405 : vector<2x5xf32>
    %407 = arith.addf %406, %403 : vector<2x5xf32>
    %cst_127 = arith.constant dense<0.000000e+00> : vector<2xf32>
    %408 = vector.multi_reduction <add>, %407, %cst_127 [1] : vector<2x5xf32> to vector<2xf32>
    %409 = vector.shape_cast %408 : vector<2xf32> to vector<2x1xf32>
    %cst_128 = arith.constant 5.000000e+00 : f32
    %410 = vector.broadcast %cst_128 : f32 to vector<2x1xf32>
    %411 = arith.divf %409, %410 : vector<2x1xf32>
    %412 = vector.broadcast %411 : vector<2x1xf32> to vector<2x5xf32>
    %413 = arith.subf %407, %412 : vector<2x5xf32>
    %414 = arith.mulf %413, %413 : vector<2x5xf32>
    %cst_129 = arith.constant dense<0.000000e+00> : vector<2xf32>
    %415 = vector.multi_reduction <add>, %414, %cst_129 [1] : vector<2x5xf32> to vector<2xf32>
    %416 = vector.shape_cast %415 : vector<2xf32> to vector<2x1xf32>
    %cst_130 = arith.constant 5.000000e+00 : f32
    %417 = vector.broadcast %cst_130 : f32 to vector<2x1xf32>
    %418 = arith.divf %416, %417 : vector<2x1xf32>
    %419 = vector.broadcast %411 : vector<2x1xf32> to vector<2x5xf32>
    %420 = arith.subf %407, %419 : vector<2x5xf32>
    %cst_131 = arith.constant 9.99999974E-6 : f32
    %421 = vector.broadcast %cst_131 : f32 to vector<2x1xf32>
    %422 = arith.addf %418, %421 : vector<2x1xf32>
    %423 = math.rsqrt %422 : vector<2x1xf32>
    %424 = vector.broadcast %423 : vector<2x1xf32> to vector<2x5xf32>
    %425 = arith.mulf %420, %424 : vector<2x5xf32>
    %426 = vector.broadcast %220 : vector<1x5xf32> to vector<2x5xf32>
    %427 = arith.mulf %425, %426 : vector<2x5xf32>
    %428 = vector.broadcast %221 : vector<1x5xf32> to vector<2x5xf32>
    %429 = arith.addf %427, %428 : vector<2x5xf32>
    %430 = arith.addf %429, %145 : vector<2x5xf32>
    %c10 = arith.constant 10 : index
    %c0_132 = arith.constant 0 : index
    %431 = vector.load %arg4[%c10, %c0_132] : memref<20x5xf32, #tpu.memory_space<vmem>>, vector<2x5xf32>
    tpu.vector_store %arg4[%c10, %c0_132], %430 {strides = array<i32>} : memref<20x5xf32, #tpu.memory_space<vmem>>, vector<2x5xf32>,
    %cst_133 = arith.constant dense<0.000000e+00> : vector<2x10xf32>
    %432 = tpu.matmul %429, %217, %cst_133 {dimension_numbers = #tpu.dot_dimension_numbers<[1], [0], [0], [1], [0, 0, 1, 1], [], []>} : vector<2x5xf32>, vector<5x10xf32>, vector<2x10xf32> -> vector<2x10xf32>
    %433 = vector.extract_strided_slice %158 {offsets = [12, 0], sizes = [2, 10], strides = [1, 1]} : vector<20x10xf32> to vector<2x10xf32>
    %434 = arith.addf %432, %433 : vector<2x10xf32>
    %435 = vector.extract_strided_slice %434 {offsets = [0, 0], sizes = [2, 5], strides = [1, 1]} : vector<2x10xf32> to vector<2x5xf32>
    %cst_134 = arith.constant 0.000000e+00 : f32
    %436 = vector.broadcast %cst_134 : f32 to vector<2x5xf32>
    %437 = arith.maximumf %435, %436 : vector<2x5xf32>
    %438 = vector.extract_strided_slice %434 {offsets = [0, 5], sizes = [2, 5], strides = [1, 1]} : vector<2x10xf32> to vector<2x5xf32>
    %cst_135 = arith.constant dense<0.000000e+00> : vector<2x5xf32>
    %439 = tpu.matmul %437, %218, %cst_135 {dimension_numbers = #tpu.dot_dimension_numbers<[1], [0], [0], [1], [0, 0, 1, 1], [], []>} : vector<2x5xf32>, vector<5x5xf32>, vector<2x5xf32> -> vector<2x5xf32>
    %440 = vector.broadcast %219 : vector<1x5xf32> to vector<2x5xf32>
    %441 = arith.addf %439, %440 : vector<2x5xf32>
    %442 = arith.addf %441, %438 : vector<2x5xf32>
    %cst_136 = arith.constant dense<0.000000e+00> : vector<2xf32>
    %443 = vector.multi_reduction <add>, %442, %cst_136 [1] : vector<2x5xf32> to vector<2xf32>
    %444 = vector.shape_cast %443 : vector<2xf32> to vector<2x1xf32>
    %cst_137 = arith.constant 5.000000e+00 : f32
    %445 = vector.broadcast %cst_137 : f32 to vector<2x1xf32>
    %446 = arith.divf %444, %445 : vector<2x1xf32>
    %447 = vector.broadcast %446 : vector<2x1xf32> to vector<2x5xf32>
    %448 = arith.subf %442, %447 : vector<2x5xf32>
    %449 = arith.mulf %448, %448 : vector<2x5xf32>
    %cst_138 = arith.constant dense<0.000000e+00> : vector<2xf32>
    %450 = vector.multi_reduction <add>, %449, %cst_138 [1] : vector<2x5xf32> to vector<2xf32>
    %451 = vector.shape_cast %450 : vector<2xf32> to vector<2x1xf32>
    %cst_139 = arith.constant 5.000000e+00 : f32
    %452 = vector.broadcast %cst_139 : f32 to vector<2x1xf32>
    %453 = arith.divf %451, %452 : vector<2x1xf32>
    %454 = vector.broadcast %446 : vector<2x1xf32> to vector<2x5xf32>
    %455 = arith.subf %442, %454 : vector<2x5xf32>
    %cst_140 = arith.constant 9.99999974E-6 : f32
    %456 = vector.broadcast %cst_140 : f32 to vector<2x1xf32>
    %457 = arith.addf %453, %456 : vector<2x1xf32>
    %458 = math.rsqrt %457 : vector<2x1xf32>
    %459 = vector.broadcast %458 : vector<2x1xf32> to vector<2x5xf32>
    %460 = arith.mulf %455, %459 : vector<2x5xf32>
    %461 = vector.broadcast %220 : vector<1x5xf32> to vector<2x5xf32>
    %462 = arith.mulf %460, %461 : vector<2x5xf32>
    %463 = vector.broadcast %221 : vector<1x5xf32> to vector<2x5xf32>
    %464 = arith.addf %462, %463 : vector<2x5xf32>
    %465 = arith.addf %464, %145 : vector<2x5xf32>
    %c12 = arith.constant 12 : index
    %c0_141 = arith.constant 0 : index
    %466 = vector.load %arg4[%c12, %c0_141] : memref<20x5xf32, #tpu.memory_space<vmem>>, vector<2x5xf32>
    tpu.vector_store %arg4[%c12, %c0_141], %465 {strides = array<i32>} : memref<20x5xf32, #tpu.memory_space<vmem>>, vector<2x5xf32>,
    %cst_142 = arith.constant dense<0.000000e+00> : vector<2x10xf32>
    %467 = tpu.matmul %464, %217, %cst_142 {dimension_numbers = #tpu.dot_dimension_numbers<[1], [0], [0], [1], [0, 0, 1, 1], [], []>} : vector<2x5xf32>, vector<5x10xf32>, vector<2x10xf32> -> vector<2x10xf32>
    %468 = vector.extract_strided_slice %158 {offsets = [14, 0], sizes = [2, 10], strides = [1, 1]} : vector<20x10xf32> to vector<2x10xf32>
    %469 = arith.addf %467, %468 : vector<2x10xf32>
    %470 = vector.extract_strided_slice %469 {offsets = [0, 0], sizes = [2, 5], strides = [1, 1]} : vector<2x10xf32> to vector<2x5xf32>
    %cst_143 = arith.constant 0.000000e+00 : f32
    %471 = vector.broadcast %cst_143 : f32 to vector<2x5xf32>
    %472 = arith.maximumf %470, %471 : vector<2x5xf32>
    %473 = vector.extract_strided_slice %469 {offsets = [0, 5], sizes = [2, 5], strides = [1, 1]} : vector<2x10xf32> to vector<2x5xf32>
    %cst_144 = arith.constant dense<0.000000e+00> : vector<2x5xf32>
    %474 = tpu.matmul %472, %218, %cst_144 {dimension_numbers = #tpu.dot_dimension_numbers<[1], [0], [0], [1], [0, 0, 1, 1], [], []>} : vector<2x5xf32>, vector<5x5xf32>, vector<2x5xf32> -> vector<2x5xf32>
    %475 = vector.broadcast %219 : vector<1x5xf32> to vector<2x5xf32>
    %476 = arith.addf %474, %475 : vector<2x5xf32>
    %477 = arith.addf %476, %473 : vector<2x5xf32>
    %cst_145 = arith.constant dense<0.000000e+00> : vector<2xf32>
    %478 = vector.multi_reduction <add>, %477, %cst_145 [1] : vector<2x5xf32> to vector<2xf32>
    %479 = vector.shape_cast %478 : vector<2xf32> to vector<2x1xf32>
    %cst_146 = arith.constant 5.000000e+00 : f32
    %480 = vector.broadcast %cst_146 : f32 to vector<2x1xf32>
    %481 = arith.divf %479, %480 : vector<2x1xf32>
    %482 = vector.broadcast %481 : vector<2x1xf32> to vector<2x5xf32>
    %483 = arith.subf %477, %482 : vector<2x5xf32>
    %484 = arith.mulf %483, %483 : vector<2x5xf32>
    %cst_147 = arith.constant dense<0.000000e+00> : vector<2xf32>
    %485 = vector.multi_reduction <add>, %484, %cst_147 [1] : vector<2x5xf32> to vector<2xf32>
    %486 = vector.shape_cast %485 : vector<2xf32> to vector<2x1xf32>
    %cst_148 = arith.constant 5.000000e+00 : f32
    %487 = vector.broadcast %cst_148 : f32 to vector<2x1xf32>
    %488 = arith.divf %486, %487 : vector<2x1xf32>
    %489 = vector.broadcast %481 : vector<2x1xf32> to vector<2x5xf32>
    %490 = arith.subf %477, %489 : vector<2x5xf32>
    %cst_149 = arith.constant 9.99999974E-6 : f32
    %491 = vector.broadcast %cst_149 : f32 to vector<2x1xf32>
    %492 = arith.addf %488, %491 : vector<2x1xf32>
    %493 = math.rsqrt %492 : vector<2x1xf32>
    %494 = vector.broadcast %493 : vector<2x1xf32> to vector<2x5xf32>
    %495 = arith.mulf %490, %494 : vector<2x5xf32>
    %496 = vector.broadcast %220 : vector<1x5xf32> to vector<2x5xf32>
    %497 = arith.mulf %495, %496 : vector<2x5xf32>
    %498 = vector.broadcast %221 : vector<1x5xf32> to vector<2x5xf32>
    %499 = arith.addf %497, %498 : vector<2x5xf32>
    %500 = arith.addf %499, %145 : vector<2x5xf32>
    %c14 = arith.constant 14 : index
    %c0_150 = arith.constant 0 : index
    %501 = vector.load %arg4[%c14, %c0_150] : memref<20x5xf32, #tpu.memory_space<vmem>>, vector<2x5xf32>
    tpu.vector_store %arg4[%c14, %c0_150], %500 {strides = array<i32>} : memref<20x5xf32, #tpu.memory_space<vmem>>, vector<2x5xf32>,
    %cst_151 = arith.constant dense<0.000000e+00> : vector<2x10xf32>
    %502 = tpu.matmul %499, %217, %cst_151 {dimension_numbers = #tpu.dot_dimension_numbers<[1], [0], [0], [1], [0, 0, 1, 1], [], []>} : vector<2x5xf32>, vector<5x10xf32>, vector<2x10xf32> -> vector<2x10xf32>
    %503 = vector.extract_strided_slice %158 {offsets = [16, 0], sizes = [2, 10], strides = [1, 1]} : vector<20x10xf32> to vector<2x10xf32>
    %504 = arith.addf %502, %503 : vector<2x10xf32>
    %505 = vector.extract_strided_slice %504 {offsets = [0, 0], sizes = [2, 5], strides = [1, 1]} : vector<2x10xf32> to vector<2x5xf32>
    %cst_152 = arith.constant 0.000000e+00 : f32
    %506 = vector.broadcast %cst_152 : f32 to vector<2x5xf32>
    %507 = arith.maximumf %505, %506 : vector<2x5xf32>
    %508 = vector.extract_strided_slice %504 {offsets = [0, 5], sizes = [2, 5], strides = [1, 1]} : vector<2x10xf32> to vector<2x5xf32>
    %cst_153 = arith.constant dense<0.000000e+00> : vector<2x5xf32>
    %509 = tpu.matmul %507, %218, %cst_153 {dimension_numbers = #tpu.dot_dimension_numbers<[1], [0], [0], [1], [0, 0, 1, 1], [], []>} : vector<2x5xf32>, vector<5x5xf32>, vector<2x5xf32> -> vector<2x5xf32>
    %510 = vector.broadcast %219 : vector<1x5xf32> to vector<2x5xf32>
    %511 = arith.addf %509, %510 : vector<2x5xf32>
    %512 = arith.addf %511, %508 : vector<2x5xf32>
    %cst_154 = arith.constant dense<0.000000e+00> : vector<2xf32>
    %513 = vector.multi_reduction <add>, %512, %cst_154 [1] : vector<2x5xf32> to vector<2xf32>
    %514 = vector.shape_cast %513 : vector<2xf32> to vector<2x1xf32>
    %cst_155 = arith.constant 5.000000e+00 : f32
    %515 = vector.broadcast %cst_155 : f32 to vector<2x1xf32>
    %516 = arith.divf %514, %515 : vector<2x1xf32>
    %517 = vector.broadcast %516 : vector<2x1xf32> to vector<2x5xf32>
    %518 = arith.subf %512, %517 : vector<2x5xf32>
    %519 = arith.mulf %518, %518 : vector<2x5xf32>
    %cst_156 = arith.constant dense<0.000000e+00> : vector<2xf32>
    %520 = vector.multi_reduction <add>, %519, %cst_156 [1] : vector<2x5xf32> to vector<2xf32>
    %521 = vector.shape_cast %520 : vector<2xf32> to vector<2x1xf32>
    %cst_157 = arith.constant 5.000000e+00 : f32
    %522 = vector.broadcast %cst_157 : f32 to vector<2x1xf32>
    %523 = arith.divf %521, %522 : vector<2x1xf32>
    %524 = vector.broadcast %516 : vector<2x1xf32> to vector<2x5xf32>
    %525 = arith.subf %512, %524 : vector<2x5xf32>
    %cst_158 = arith.constant 9.99999974E-6 : f32
    %526 = vector.broadcast %cst_158 : f32 to vector<2x1xf32>
    %527 = arith.addf %523, %526 : vector<2x1xf32>
    %528 = math.rsqrt %527 : vector<2x1xf32>
    %529 = vector.broadcast %528 : vector<2x1xf32> to vector<2x5xf32>
    %530 = arith.mulf %525, %529 : vector<2x5xf32>
    %531 = vector.broadcast %220 : vector<1x5xf32> to vector<2x5xf32>
    %532 = arith.mulf %530, %531 : vector<2x5xf32>
    %533 = vector.broadcast %221 : vector<1x5xf32> to vector<2x5xf32>
    %534 = arith.addf %532, %533 : vector<2x5xf32>
    %535 = arith.addf %534, %145 : vector<2x5xf32>
    %c16_159 = arith.constant 16 : index
    %c0_160 = arith.constant 0 : index
    %536 = vector.load %arg4[%c16_159, %c0_160] : memref<20x5xf32, #tpu.memory_space<vmem>>, vector<2x5xf32>
    tpu.vector_store %arg4[%c16_159, %c0_160], %535 {strides = array<i32>} : memref<20x5xf32, #tpu.memory_space<vmem>>, vector<2x5xf32>,
    %cst_161 = arith.constant dense<0.000000e+00> : vector<2x10xf32>
    %537 = tpu.matmul %534, %217, %cst_161 {dimension_numbers = #tpu.dot_dimension_numbers<[1], [0], [0], [1], [0, 0, 1, 1], [], []>} : vector<2x5xf32>, vector<5x10xf32>, vector<2x10xf32> -> vector<2x10xf32>
    %538 = vector.extract_strided_slice %158 {offsets = [18, 0], sizes = [2, 10], strides = [1, 1]} : vector<20x10xf32> to vector<2x10xf32>
    %539 = arith.addf %537, %538 : vector<2x10xf32>
    %540 = vector.extract_strided_slice %539 {offsets = [0, 0], sizes = [2, 5], strides = [1, 1]} : vector<2x10xf32> to vector<2x5xf32>
    %cst_162 = arith.constant 0.000000e+00 : f32
    %541 = vector.broadcast %cst_162 : f32 to vector<2x5xf32>
    %542 = arith.maximumf %540, %541 : vector<2x5xf32>
    %543 = vector.extract_strided_slice %539 {offsets = [0, 5], sizes = [2, 5], strides = [1, 1]} : vector<2x10xf32> to vector<2x5xf32>
    %cst_163 = arith.constant dense<0.000000e+00> : vector<2x5xf32>
    %544 = tpu.matmul %542, %218, %cst_163 {dimension_numbers = #tpu.dot_dimension_numbers<[1], [0], [0], [1], [0, 0, 1, 1], [], []>} : vector<2x5xf32>, vector<5x5xf32>, vector<2x5xf32> -> vector<2x5xf32>
    %545 = vector.broadcast %219 : vector<1x5xf32> to vector<2x5xf32>
    %546 = arith.addf %544, %545 : vector<2x5xf32>
    %547 = arith.addf %546, %543 : vector<2x5xf32>
    %cst_164 = arith.constant dense<0.000000e+00> : vector<2xf32>
    %548 = vector.multi_reduction <add>, %547, %cst_164 [1] : vector<2x5xf32> to vector<2xf32>
    %549 = vector.shape_cast %548 : vector<2xf32> to vector<2x1xf32>
    %cst_165 = arith.constant 5.000000e+00 : f32
    %550 = vector.broadcast %cst_165 : f32 to vector<2x1xf32>
    %551 = arith.divf %549, %550 : vector<2x1xf32>
    %552 = vector.broadcast %551 : vector<2x1xf32> to vector<2x5xf32>
    %553 = arith.subf %547, %552 : vector<2x5xf32>
    %554 = arith.mulf %553, %553 : vector<2x5xf32>
    %cst_166 = arith.constant dense<0.000000e+00> : vector<2xf32>
    %555 = vector.multi_reduction <add>, %554, %cst_166 [1] : vector<2x5xf32> to vector<2xf32>
    %556 = vector.shape_cast %555 : vector<2xf32> to vector<2x1xf32>
    %cst_167 = arith.constant 5.000000e+00 : f32
    %557 = vector.broadcast %cst_167 : f32 to vector<2x1xf32>
    %558 = arith.divf %556, %557 : vector<2x1xf32>
    %559 = vector.broadcast %551 : vector<2x1xf32> to vector<2x5xf32>
    %560 = arith.subf %547, %559 : vector<2x5xf32>
    %cst_168 = arith.constant 9.99999974E-6 : f32
    %561 = vector.broadcast %cst_168 : f32 to vector<2x1xf32>
    %562 = arith.addf %558, %561 : vector<2x1xf32>
    %563 = math.rsqrt %562 : vector<2x1xf32>
    %564 = vector.broadcast %563 : vector<2x1xf32> to vector<2x5xf32>
    %565 = arith.mulf %560, %564 : vector<2x5xf32>
    %566 = vector.broadcast %220 : vector<1x5xf32> to vector<2x5xf32>
    %567 = arith.mulf %565, %566 : vector<2x5xf32>
    %568 = vector.broadcast %221 : vector<1x5xf32> to vector<2x5xf32>
    %569 = arith.addf %567, %568 : vector<2x5xf32>
    %570 = arith.addf %569, %145 : vector<2x5xf32>
    %c18 = arith.constant 18 : index
    %c0_169 = arith.constant 0 : index
    %571 = vector.load %arg4[%c18, %c0_169] : memref<20x5xf32, #tpu.memory_space<vmem>>, vector<2x5xf32>
    tpu.vector_store %arg4[%c18, %c0_169], %570 {strides = array<i32>} : memref<20x5xf32, #tpu.memory_space<vmem>>, vector<2x5xf32>,
    return
  }
  func.func @transform_0(%arg0: i32) -> (i32, i32) {
    %c0_i32 = arith.constant 0 : i32
    %c0_i32_0 = arith.constant 0 : i32
    %c0_i32_1 = arith.constant 0 : i32
    return %c0_i32, %c0_i32_0 : i32, i32
  }
  func.func @transform_1(%arg0: i32) -> (i32, i32) {
    %c0_i32 = arith.constant 0 : i32
    %c0_i32_0 = arith.constant 0 : i32
    %c0_i32_1 = arith.constant 0 : i32
    return %c0_i32, %c0_i32_0 : i32, i32
  }
  func.func @transform_2(%arg0: i32) -> (i32, i32) {
    %c0_i32 = arith.constant 0 : i32
    %c0_i32_0 = arith.constant 0 : i32
    %c0_i32_1 = arith.constant 0 : i32
    return %c0_i32, %c0_i32_0 : i32, i32
  }
  func.func @transform_3(%arg0: i32) -> (i32, i32) {
    %c0_i32 = arith.constant 0 : i32
    %c0_i32_0 = arith.constant 0 : i32
    %c0_i32_1 = arith.constant 0 : i32
    return %c0_i32, %c0_i32_0 : i32, i32
  }
}

</mosaic_0001>

<bundles_post_ra>
// kernel: tide_forward.1
= control target key start
LH: loop header
LB: loop body
LE: loop exit
PB: predicated region body
PF: predicated region fallthrough
CT: control target
= control target key end

     0   :  { %vm22_vm0 = vcmask 64512   ;;  %vm113_vm1 = vcmask 130048   ;;  %vm210_vm2 = vcmask 1044480   ;;  %vm203_vm3 = vcmask 39936   ;;  %s3378_s27 = smov 123   ;;  %s3379_s17 = smov 112   ;;  %s3937_s2 = inlined_call_operand.vmem [shape: f32[224,128], index: 2, kind: input, shape index: {}]   ;;  %s3938_s0 = inlined_call_operand.vmem [shape: f32[16,8], index: 0, kind: input, shape index: {}]   ;;  %s3939_s1 = inlined_call_operand.vmem [shape: f32[20,8], index: 1, kind: input, shape index: {}]   ;;  %s3940_s3 = inlined_call_operand.vmem [shape: f32[20,5], index: 3, kind: output, shape index: {}]  }
   0x1   :  { %v16_v0 = vld [vmem:[%s3937_s2] sm:$0xff]  ;;  %v15_v2 = vld [vmem:[%s3938_s0 + $0x8] sm:$0xff]  ;;  %v107_v3 = vld [vmem:[%s3937_s2 + $0x18] sm:$0xff]  ;;  %vm3381_vm4 = vmmov 0   ;;  %vm694_vm11 = vcmask 15360   ;;  %vm1418_vm15 = vcmask 33792  }
   0x2   :  { %v14_v1 = vld [vmem:[%s3938_s0] sm:$0xff]  ;;  %3149 = vmatprep.subr.mxu0 %v16_v0  ;;  %3154 = vmatprep.subr.mxu1 %v107_v3  ;;  %v106_v4 = vld [vmem:[%s3937_s2 + $0x10] sm:$0xff]  ;;  %v2986_v5 = vld [vmem:[%s3937_s2 + $0x8] ss:$0 sm:$0xff] }
   0x3   :  { %3151 = vmatprep.mubr.msk.f32.mxu0 %vm22_vm0, %v14_v1  ;;  %3150 = vmatpush3.msra.mxu0 %v16_v0  ;;  %v197_v12 = vld [vmem:[%s3937_s2 + $0x28] sm:$0x1f]  ;;  %v2989_v13 = vld [vmem:[%s3937_s2 + $0x20] ss:$0 sm:$0xff]  ;;  %v2992_v22 = vld [vmem:[%s3937_s2 + $0x30] ss:$0 sm:$0xff] }
   0x4   :  { %3152 = vmatmul.mubr.msk.f32.vlgmr.msra.gmra.mxu0 %vm22_vm0, %v15_v2  ;;  %3155 = vmatpush3.msra.mxu1 %v107_v3  ;;  %v340_v41 = vld [vmem:[%s3937_s2 + $0x48] sm:$0x1f]  ;;  %v2996_v49 = vld [vmem:[%s3937_s2 + $0x38] ss:$0 sm:$0xff]  ;;  %v2997_v51 = vld [vmem:[%s3937_s2 + $0x40] ss:$0 sm:$0xff] }
   0x5   :  { %3156 = vmatprep.subr.mxu1 %v106_v4  ;;  %3161 = vmatprep.subr.msk.mxu0 %vm210_vm2, %v197_v12  ;;  %v432_v58 = vld [vmem:[%s3937_s2 + $0x58] sm:$0x1f]  ;;  %v2998_v59 = vld [vmem:[%s3937_s2 + $0x50] ss:$0 sm:$0xff]  ;;  %v3002_v3 = vld [vmem:[%s3937_s2 + $0x60] ss:$0 sm:$0xff] }
   0x6   :  { %3157 = vmatpush3.msra.mxu1 %v106_v4  ;;  %3162 = vmatpush3.msk.msra.mxu0 %vm210_vm2, %v197_v12 }
   0x7   :  { %3166 = vmatprep.subr.msk.mxu1 %vm210_vm2, %v340_v41  ;;  %3171 = vmatprep.subr.msk.mxu0 %vm210_vm2, %v432_v58 }
  0xc4   :  { %v3153_v6 = vpop.f32.mrf.mxu0 }
  0xc5   :  { %v101_v7 = vadd.f32 %v3153_v6, %v2986_v5 }
  0xc6   :  { %v95_v8 = vpop.f32.mrf.mxu0 }
  0xc7   :  { %v96_v9 = vadd.f32 %v2986_v5, %v95_v8  ;;  %v3424_v11 = vmax.f32 %v101_v7, 0.0 }
  0xc9   :  { %v3422_v10 = vmax.f32 %v96_v9, 0.0 }
  0xcb   :  { %3158 = vmatprep.mubr.msk.f32.mxu1 %vm113_vm1, %v3422_v10 }
  0xcc   :  { %3159 = vmatmul.mubr.msk.f32.vlgmr.msra.gmra.mxu1 %vm113_vm1, %v3424_v11 }
  0xcd   :  { %3167 = vmatpush3.msk.msra.mxu1 %vm210_vm2, %v340_v41  ;;  %v3006_v41 = vld [vmem:[%s3937_s2 + $0x68] ss:$0 sm:$0xff] }
 0x18c   :  { %v3160_v14 = vpop.f32.mrf.mxu1 }
 0x18d   :  { %v192_v15 = vadd.f32 %v3160_v14, %v2989_v13 }
 0x18e   :  { %v186_v16 = vpop.f32.mrf.mxu1 }
 0x18f   :  { %v187_v17 = vadd.f32 %v2989_v13, %v186_v16  ;;  %v196_v19 = vmax.f32 %v192_v15, 0.0 }
 0x191   :  { %v195_v18 = vmax.f32 %v187_v17, 0.0  ;;  %291 = vrot.lane.b32.xlu0 %v187_v17, %s3378_s27 }
 0x193   :  { %3163 = vmatprep.mubr.msk.f32.mxu0 %vm203_vm3, %v195_v18 }
 0x194   :  { %3164 = vmatmul.mubr.msk.f32.vlgmr.msra.gmra.mxu0 %vm203_vm3, %v196_v19 }
 0x195   :  { %293 = vrot.lane.b32.xlu0 %v192_v15, %s3378_s27  ;;  %3172 = vmatpush3.msk.msra.mxu0 %vm210_vm2, %v432_v58  ;;  %v572_v15 = vld [vmem:[%s3937_s2 + $0x78] sm:$0x1f] }
 0x196   :  { %3176 = vmatprep.subr.msk.mxu1 %vm210_vm2, %v572_v15 }
 0x203   :  { %v292_v20 = vpop.permute.xlu0 %291 }
 0x207   :  { %v294_v27 = vpop.permute.xlu0 %293 }
 0x254   :  { %v3165_v21 = vpop.f32.mrf.mxu0 }
 0x255   :  { %v286_v24 = vadd.f32 %v3165_v21, %v2992_v22 }
 0x256   :  { %v280_v23 = vpop.f32.mrf.mxu0 }
 0x257   :  { %v281_v25 = vadd.f32 %v2992_v22, %v280_v23  ;;  %v298_v29 = vadd.f32 %v294_v27, %v286_v24 }
 0x259   :  { %v297_v26 = vadd.f32 %v292_v20, %v281_v25  ;;  %v304_v30 = vsel %vm203_vm3, %v298_v29, 0.0 }
 0x25b   :  { %v301_v28 = vsel %vm203_vm3, %v297_v26, 0.0 }
 0x25c   :  { %302 = vadd.xlane.f32.xlu1 %v301_v28  ;;  %v835_v28 = vld [vmem:[%s3937_s2 + $0x98] sm:$0xff] }
 0x260   :  { %305 = vadd.xlane.f32.xlu1 %v304_v30  ;;  %v3380_v30 = vmov 0.0  }
 0x261   :  { %3181 = vmatprep.subr.mxu0 %v3380_v30 }
 0x2e5   :  { %v303_v31 = vpop.xlane.xlu1 %302 }
 0x2e6   :  { %v308_v32 = vmul.f32 0.2, %v303_v31  ;;  %v832_v31 = vld [vmem:[%s3939_s1] sm:$0xff] }
 0x2e8   :  { %v310_v33 = vsub.f32 %v297_v26, %v308_v32  ;;  %v833_v32 = vld [vmem:[%s3939_s1 + $0x8] sm:$0xff] }
 0x2e9   :  { %v306_v34 = vpop.xlane.xlu1 %305 }
 0x2ea   :  { %v309_v35 = vmul.f32 0.2, %v306_v34  ;;  %v312_v36 = vmul.f32 %v310_v33, %v310_v33 }
 0x2ec   :  { %v311_v37 = vsub.f32 %v298_v29, %v309_v35  ;;  %v314_v38 = vsel %vm203_vm3, %v312_v36, 0.0  ;;  %v1031_v29 = vld [vmem:[%s3937_s2 + $0x88] sm:$0x1f] }
 0x2ed   :  { %315 = vadd.xlane.f32.xlu0 %v314_v38 }
 0x2ee   :  { %v313_v39 = vmul.f32 %v311_v37, %v311_v37 }
 0x2f0   :  { %v317_v40 = vsel %vm203_vm3, %v313_v39, 0.0 }
 0x2f1   :  { %318 = vadd.xlane.f32.xlu1 %v317_v40 }
 0x376   :  { %v316_v42 = vpop.xlane.xlu0 %315 }
 0x377   :  { %v320_v43 = vmul.f32 0.2, %v316_v42 }
 0x379   :  { %v322_v44 = vadd.f32 1e-05, %v320_v43 }
 0x37a   :  { %v319_v45 = vpop.xlane.xlu1 %318 }
 0x37b   :  { %3326 = vrsqrt.f32 %v322_v44  ;;  %v321_v46 = vmul.f32 0.2, %v319_v45 }
 0x37d   :  { %v323_v47 = vadd.f32 1e-05, %v321_v46  ;;  %v3007_v46 = vld [vmem:[%s3937_s2 + $0x70] ss:$0 sm:$0xff] }
 0x37f   :  { %3328 = vrsqrt.f32 %v323_v47 }
 0x388   :  { %v3327_v48 = vpop.eup %3326 }
 0x389   :  { %v326_v50 = vmul.f32 %v3327_v48, %v310_v33  ;;  %v834_v33 = vld [vmem:[%s3939_s1 + $0x10] sm:$0xf] }
 0x38b   :  { %v332_v52 = vmul.f32 %v2996_v49, %v326_v50 }
 0x38c   :  { %v3329_v53 = vpop.eup %3328 }
 0x38d   :  { %v327_v54 = vmul.f32 %v3329_v53, %v311_v37  ;;  %v338_v55 = vadd.f32 %v2997_v51, %v332_v52 }
 0x38f   :  { %v333_v56 = vmul.f32 %v2996_v49, %v327_v54  ;;  %3168 = vmatprep.mubr.msk.f32.mxu1 %vm203_vm3, %v338_v55  ;;  %v3011_v54 = vld [vmem:[%s3937_s2 + $0x80] ss:$0 sm:$0xff] }
 0x391   :  { %v339_v57 = vadd.f32 %v2997_v51, %v333_v56 }
 0x393   :  { %3169 = vmatmul.mubr.msk.f32.vlgmr.msra.gmra.mxu1 %vm203_vm3, %v339_v57 }
 0x394   :  { %3177 = vmatpush3.msk.msra.mxu1 %vm210_vm2, %v572_v15 }
 0x395   :  { %3188 = vmatprep.subr.mxu1 %v3380_v30 }
 0x453   :  { %v3170_v60 = vpop.f32.mrf.mxu1 }
 0x454   :  { %v427_v61 = vadd.f32 %v3170_v60, %v2998_v59 }
 0x455   :  { %v421_v62 = vpop.f32.mrf.mxu1 }
 0x456   :  { %v422_v63 = vadd.f32 %v2998_v59, %v421_v62  ;;  %v431_v1 = vmax.f32 %v427_v61, 0.0 }
 0x458   :  { %v430_v0 = vmax.f32 %v422_v63, 0.0  ;;  %524 = vrot.lane.b32.xlu1 %v422_v63, %s3378_s27 }
 0x45a   :  { %3173 = vmatprep.mubr.msk.f32.mxu0 %vm203_vm3, %v430_v0 }
 0x45b   :  { %3174 = vmatmul.mubr.msk.f32.vlgmr.msra.gmra.mxu0 %vm203_vm3, %v431_v1  ;;  %v674_v1 = vlaneseq }
 0x45c   :  { %526 = vrot.lane.b32.xlu1 %v427_v61, %s3378_s27  ;;  %3185 = vmatprep.mubr.msk.f32.mxu0 %vm3381_vm4, %v3380_v30 }
 0x4ca   :  { %v525_v2 = vpop.permute.xlu1 %524 }
 0x4ce   :  { %v527_v6 = vpop.permute.xlu1 %526 }
 0x51b   :  { %v3175_v4 = vpop.f32.mrf.mxu0 }
 0x51c   :  { %v519_v5 = vadd.f32 %v3175_v4, %v3002_v3  ;;  %v3553_v4 = vshrl.u32 %v674_v1, 7 }
 0x51d   :  { %v513_v7 = vpop.f32.mrf.mxu0 }
 0x51e   :  { %v514_v8 = vadd.f32 %v3002_v3, %v513_v7  ;;  %v531_v9 = vadd.f32 %v527_v6, %v519_v5  ;;  %v676_v7 = vadd.s32 8, %v3553_v4 }
 0x520   :  { %v537_v12 = vsel %vm203_vm3, %v531_v9, 0.0  ;;  %v530_v13 = vadd.f32 %v525_v2, %v514_v8  ;;  %v3550_v2 = vand.u32 127, %v674_v1 }
 0x521   :  { %538 = vadd.xlane.f32.xlu0 %v537_v12 }
 0x522   :  { %v534_v14 = vsel %vm203_vm3, %v530_v13, 0.0  ;;  %v682_v3 = vadd.s32 1, %v3550_v2  ;;  %v679_v5 = vmul.u32 8, %v3550_v2 }
 0x523   :  { %535 = vadd.xlane.f32.xlu1 %v534_v14 }
 0x524   :  { %v683_v6 = vmul.u32 8, %v682_v3  ;;  %vm680_vm5 = vcmp.ge.s32.totalorder %v3553_v4, %v679_v5  ;;  %vm681_vm7 = vcmp.ge.s32.totalorder %v676_v7, %v679_v5 }
 0x526   :  { %vm684_vm6 = vcmp.lt.s32.totalorder %v3553_v4, %v683_v6  ;;  %vm685_vm8 = vcmp.lt.s32.totalorder %v676_v7, %v683_v6 }
 0x527   :  { %vm3559_vm9 = vmand %vm680_vm5, %vm684_vm6 }
 0x528   :  { %vm3563_vm10 = vmand %vm681_vm7, %vm685_vm8 }
 0x537   :  { %574 = vrot.lane.b32.xlu0 %v3422_v10, %s3379_s17 }
 0x53b   :  { %576 = vrot.lane.b32.xlu0 %v3424_v11, %s3379_s17 }
 0x5aa   :  { %v539_v16 = vpop.xlane.xlu0 %538 }
 0x5ab   :  { %v541_v17 = vmul.f32 0.2, %v539_v16 }
 0x5ac   :  { %v536_v18 = vpop.xlane.xlu1 %535 }
 0x5ad   :  { %v543_v19 = vsub.f32 %v531_v9, %v541_v17  ;;  %v540_v20 = vmul.f32 0.2, %v536_v18 }
 0x5ae   :  { %v575_v21 = vpop.permute.xlu0 %574 }
 0x5af   :  { %v542_v22 = vsub.f32 %v530_v13, %v540_v20  ;;  %3178 = vmatprep.mubr.msk.f32.mxu1 %vm203_vm3, %v575_v21  ;;  %v545_v23 = vmul.f32 %v543_v19, %v543_v19 }
 0x5b1   :  { %v549_v24 = vsel %vm203_vm3, %v545_v23, 0.0  ;;  %v544_v25 = vmul.f32 %v542_v22, %v542_v22 }
 0x5b2   :  { %v577_v26 = vpop.permute.xlu0 %576  ;;  %550 = vadd.xlane.f32.xlu1 %v549_v24 }
 0x5b3   :  { %3179 = vmatmul.mubr.msk.f32.vlgmr.msra.gmra.mxu1 %vm203_vm3, %v577_v26  ;;  %v546_v27 = vsel %vm203_vm3, %v544_v25, 0.0 }
 0x5b4   :  { %547 = vadd.xlane.f32.xlu0 %v546_v27  ;;  %3190 = vmatprep.mubr.msk.f32.mxu1 %vm3381_vm4, %v3380_v30 }
 0x5b5   :  { %3189 = vmatpush3.msra.mxu1 %v835_v28  ;;  %v3028_v28 = vld [vmem:[%s3937_s2 + $0x90] ss:$0 sm:$0xff] }
 0x5b6   :  { %3210 = vmatprep.subr.msk.mxu1 %vm210_vm2, %v1031_v29 }
 0x5b7   :  { %3191 = vmatmul.mubr.msk.f32.vlgmr.msra.gmra.mxu1 %vm22_vm0, %v832_v31 }
 0x5b8   :  { %3193 = vmatprep.mubr.msk.f32.mxu1 %vm3381_vm4, %v3380_v30  ;;  %3211 = vmatpush3.msk.msra.mxu1 %vm210_vm2, %v1031_v29 }
 0x5b9   :  { %3222 = vmatprep.subr.mxu1 %v3380_v30 }
 0x5bb   :  { %3194 = vmatmul.mubr.msk.f32.gmra.mxu1 %vm22_vm0, %v833_v32 }
 0x5bc   :  { %3196 = vmatprep.mubr.msk.f32.mxu1 %vm3381_vm4, %v3380_v30 }
 0x5bf   :  { %3197 = vmatmul.mubr.msk.f32.gmra.mxu1 %vm22_vm0, %v834_v33 }
 0x63b   :  { %v551_v34 = vpop.xlane.xlu1 %550 }
 0x63c   :  { %v553_v35 = vmul.f32 0.2, %v551_v34  ;;  %v3580_v34 = vsel %vm3559_vm9, 1.0, %v3380_v30 }
 0x63d   :  { %v548_v36 = vpop.xlane.xlu0 %547 }
 0x63e   :  { %v555_v37 = vadd.f32 1e-05, %v553_v35  ;;  %v552_v38 = vmul.f32 0.2, %v548_v36 }
 0x640   :  { %3330 = vrsqrt.f32 %v555_v37  ;;  %v554_v39 = vadd.f32 1e-05, %v552_v38  ;;  %v3587_v37 = vsel %vm3563_vm10, 1.0, %v3380_v30 }
 0x642   :  { %3332 = vrsqrt.f32 %v554_v39 }
 0x64d   :  { %v3331_v40 = vpop.eup %3330 }
 0x64e   :  { %v559_v42 = vmul.f32 %v3331_v40, %v543_v19 }
 0x64f   :  { %v3333_v43 = vpop.eup %3332 }
 0x650   :  { %v558_v44 = vmul.f32 %v3333_v43, %v542_v22  ;;  %v565_v45 = vmul.f32 %v3006_v41, %v559_v42 }
 0x652   :  { %v564_v47 = vmul.f32 %v3006_v41, %v558_v44  ;;  %v3531_v49 = vadd.f32 %v3007_v46, %v565_v45 }
 0x654   :  { %v3529_v48 = vadd.f32 %v3007_v46, %v564_v47 }
 0x656   :  { %3212 = vmatprep.mubr.msk.f32.mxu1 %vm203_vm3, %v3529_v48 }
 0x657   :  { %3213 = vmatmul.mubr.msk.f32.vlgmr.msra.gmra.mxu1 %vm203_vm3, %v3531_v49 }
 0x658   :  { %3224 = vmatprep.mubr.msk.f32.mxu1 %vm3381_vm4, %v3380_v30 }
 0x673   :  { %v3180_v50 = vpop.f32.mrf.mxu1 }
 0x674   :  { %3334 = vtanh.f32 %v3180_v50 }
 0x675   :  { %v651_v51 = vpop.f32.mrf.mxu1 }
 0x676   :  { %3336 = vtanh.f32 %v651_v51 }
 0x677   :  { %v3542_v56 = vpop.f32.mrf.mxu1 }
 0x679   :  { %v3192_v59 = vpop.f32.mrf.mxu1 }
 0x67b   :  { %v3545_v60 = vpop.f32.mrf.mxu1 }
 0x67d   :  { %v3195_v62 = vpop.f32.mrf.mxu1 }
 0x67f   :  { %v3548_v63 = vpop.f32.mrf.mxu1 }
 0x681   :  { %v3335_v52 = vpop.eup %3334  ;;  %v3198_v0 = vpop.f32.mrf.mxu1 }
 0x682   :  { %v667_v58 = vmul.f32 %v3335_v52, %v3011_v54 }
 0x683   :  { %v3337_v53 = vpop.eup %3336 }
 0x684   :  { %v666_v55 = vmul.f32 %v3337_v53, %v3011_v54  ;;  %v671_v61 = vsel %vm203_vm3, %v667_v58, 0.0 }
 0x686   :  { %v668_v57 = vsel %vm203_vm3, %v666_v55, 0.0 }
 0x687   :  { %669 = vadd.xlane.f32.xlu1 %v668_v57 }
 0x68b   :  { %672 = vadd.xlane.f32.xlu1 %v671_v61 }
 0x710   :  { %v670_v9 = vpop.xlane.xlu1 %669 }
 0x711   :  { %v692_v13 = vsel %vm3559_vm9, %v670_v9, -inf }
 0x712   :  { %v695_v16 = vsel %vm694_vm11, %v692_v13, -inf }
 0x714   :  { %v673_v14 = vpop.xlane.xlu1 %672 }
 0x715   :  { %v693_v15 = vsel %vm3563_vm10, %v673_v14, -inf }
 0x716   :  { %v696_v17 = vsel %vm694_vm11, %v693_v15, -inf }
 0x717   :  { %v697_v18 = vmax.f32 %v695_v16, %v696_v17  ;;  %v3214_v19 = vpop.f32.mrf.mxu1 }
 0x718   :  { %3338 = vtanh.f32 %v3214_v19 }
 0x719   :  { %v698_v20 = vrot.slane %v697_v18, 4  ;;  %v1108_v21 = vpop.f32.mrf.mxu1 }
 0x71a   :  { %3340 = vtanh.f32 %v1108_v21 }
 0x71b   :  { %v699_v22 = vmax.f32 %v697_v18, %v698_v20 }
 0x71d   :  { %v700_v23 = vrot.slane %v699_v22, 2 }
 0x71f   :  { %v701_v24 = vmax.f32 %v699_v22, %v700_v23 }
 0x721   :  { %v702_v26 = vrot.slane %v701_v24, 1 }
 0x723   :  { %v703_v33 = vmax.f32 %v701_v24, %v702_v26 }
 0x725   :  { %v3339_v25 = vpop.eup %3338  ;;  %v704_v36 = vmul.f32 %v3580_v34, %v703_v33  ;;  %v705_v39 = vmul.f32 %v3587_v37, %v703_v33 }
 0x726   :  { %v1124_v32 = vmul.f32 %v3339_v25, %v3028_v28 }
 0x727   :  { %v3341_v27 = vpop.eup %3340  ;;  %v706_v38 = vsel %vm694_vm11, %v704_v36, 0.0  ;;  %v709_v40 = vsel %vm694_vm11, %v705_v39, 0.0 }
 0x728   :  { %v1123_v29 = vmul.f32 %v3341_v27, %v3028_v28  ;;  %v1128_v35 = vsel %vm203_vm3, %v1124_v32, 0.0 }
 0x72a   :  { %v1125_v31 = vsel %vm203_vm3, %v1123_v29, 0.0 }
 0x72b   :  { %1126 = vadd.xlane.f32.xlu1 %v1125_v31 }
 0x72f   :  { %1129 = vadd.xlane.f32.xlu1 %v1128_v35 }
 0x733   :  { %707 = vadd.xlane.f32.xlu1 %v706_v38 }
 0x737   :  { %710 = vadd.xlane.f32.xlu1 %v709_v40 }
 0x7b4   :  { %v1127_v41 = vpop.xlane.xlu1 %1126 }
 0x7b5   :  { %v1131_v42 = vsel %vm3559_vm9, %v1127_v41, -inf }
 0x7b6   :  { %v1133_v45 = vsel %vm694_vm11, %v1131_v42, -inf }
 0x7b8   :  { %v1130_v43 = vpop.xlane.xlu1 %1129 }
 0x7b9   :  { %v1132_v44 = vsel %vm3563_vm10, %v1130_v43, -inf }
 0x7ba   :  { %v1134_v46 = vsel %vm694_vm11, %v1132_v44, -inf }
 0x7bb   :  { %v1135_v47 = vmax.f32 %v1133_v45, %v1134_v46 }
 0x7bc   :  { %v708_v50 = vpop.xlane.xlu1 %707 }
 0x7bd   :  { %v1136_v51 = vrot.slane %v1135_v47, 4  ;;  %v712_v52 = vsub.f32 %v670_v9, %v708_v50 }
 0x7bf   :  { %v1137_v53 = vmax.f32 %v1135_v47, %v1136_v51  ;;  %v714_v54 = vmul.f32 1.442695, %v712_v52 }
 0x7c0   :  { %v711_v55 = vpop.xlane.xlu1 %710 }
 0x7c1   :  { %v1138_v57 = vrot.slane %v1137_v53, 2  ;;  %3342 = vpow2.f32 %v714_v54  ;;  %v713_v58 = vsub.f32 %v673_v14, %v711_v55 }
 0x7c3   :  { %v716_v59 = vmul.f32 1.442695, %v713_v58  ;;  %v1139_v61 = vmax.f32 %v1137_v53, %v1138_v57 }
 0x7c5   :  { %3344 = vpow2.f32 %v716_v59  ;;  %v1140_v62 = vrot.slane %v1139_v61, 1 }
 0x7c7   :  { %v1141_v0 = vmax.f32 %v1139_v61, %v1140_v62 }
 0x7c9   :  { %v1143_v1 = vmul.f32 %v3587_v37, %v1141_v0  ;;  %v1142_v3 = vmul.f32 %v3580_v34, %v1141_v0 }
 0x7cb   :  { %v1147_v5 = vsel %vm694_vm11, %v1143_v1, 0.0  ;;  %v1144_v6 = vsel %vm694_vm11, %v1142_v3, 0.0 }
 0x7cc   :  { %1148 = vadd.xlane.f32.xlu0 %v1147_v5  ;;  %1145 = vadd.xlane.f32.xlu1 %v1144_v6 }
 0x7ce   :  { %v3343_v7 = vpop.eup %3342 }
 0x7cf   :  { %v718_v8 = vmul.f32 %v3343_v7, %v3580_v34 }
 0x7d1   :  { %v720_v13 = vsel %vm694_vm11, %v718_v8, 0.0 }
 0x7d2   :  { %v3345_v9 = vpop.eup %3344 }
 0x7d3   :  { %v719_v12 = vmul.f32 %v3345_v9, %v3587_v37 }
 0x7d5   :  { %v721_v14 = vsel %vm694_vm11, %v719_v12, 0.0 }
 0x7d6   :  { %v722_v15 = vadd.f32 %v721_v14, %v720_v13 }
 0x7d8   :  { %v723_v16 = vrot.slane %v722_v15, 4 }
 0x7da   :  { %v724_v17 = vadd.f32 %v723_v16, %v722_v15 }
 0x7dc   :  { %v725_v18 = vrot.slane %v724_v17, 2 }
 0x7de   :  { %v726_v19 = vadd.f32 %v725_v18, %v724_v17 }
 0x7e0   :  { %v727_v20 = vrot.slane %v726_v19, 1 }
 0x7e2   :  { %v728_v21 = vadd.f32 %v727_v20, %v726_v19 }
 0x7e4   :  { %v730_v22 = vmul.f32 %v3587_v37, %v728_v21  ;;  %v729_v23 = vmul.f32 %v3580_v34, %v728_v21  ;;  %v3020_v21 = vld [vmem:[%s3937_s2 + $0xb8] ss:$0 sm:$0xff] }
 0x7e6   :  { %v734_v24 = vsel %vm694_vm11, %v730_v22, 0.0  ;;  %v731_v25 = vsel %vm694_vm11, %v729_v23, 0.0 }
 0x7e7   :  { %735 = vadd.xlane.f32.xlu1 %v734_v24  ;;  %732 = vadd.xlane.f32.xlu0 %v731_v25 }
 0x855   :  { %v1149_v26 = vpop.xlane.xlu0 %1148  ;;  %v1146_v27 = vpop.xlane.xlu1 %1145 }
 0x856   :  { %v1151_v28 = vsub.f32 %v1130_v43, %v1149_v26  ;;  %v1150_v29 = vsub.f32 %v1127_v41, %v1146_v27 }
 0x858   :  { %v1154_v31 = vmul.f32 1.442695, %v1151_v28  ;;  %v1152_v32 = vmul.f32 1.442695, %v1150_v29 }
 0x85a   :  { %3346 = vpow2.f32 %v1154_v31  ;;  %v3693_v31 = vld [vmem:[%s3937_s2 + $0xc0] sm:$0x1f] }
 0x85b   :  { %3348 = vpow2.f32 %v1152_v32 }
 0x867   :  { %v3610_v33 = vpop.eup %3346 }
 0x868   :  { %v3612_v35 = vpop.eup %3348  ;;  %v1157_v36 = vmul.f32 %v3610_v33, %v3587_v37 }
 0x869   :  { %v1156_v38 = vmul.f32 %v3612_v35, %v3580_v34 }
 0x86a   :  { %v1159_v39 = vsel %vm694_vm11, %v1157_v36, 0.0 }
 0x86b   :  { %v1158_v40 = vsel %vm694_vm11, %v1156_v38, 0.0 }
 0x86c   :  { %v1160_v42 = vadd.f32 %v1159_v39, %v1158_v40  ;;  %v3711_v39 = vld [vmem:[%s3937_s2 + $0xc8] ss:$0 sm:$0xff] }
 0x86e   :  { %v1161_v41 = vrot.slane %v1160_v42, 4 }
 0x870   :  { %v1162_v43 = vadd.f32 %v1161_v41, %v1160_v42  ;;  %v736_v46 = vpop.xlane.xlu1 %735  ;;  %v733_v51 = vpop.xlane.xlu0 %732 }
 0x871   :  { %3350 = vrcp.f32 %v736_v46 }
 0x872   :  { %v1163_v44 = vrot.slane %v1162_v43, 2  ;;  %3352 = vrcp.f32 %v733_v51 }
 0x874   :  { %v1164_v45 = vadd.f32 %v1163_v44, %v1162_v43 }
 0x876   :  { %v1165_v47 = vrot.slane %v1164_v45, 1 }
 0x878   :  { %v1166_v50 = vadd.f32 %v1165_v47, %v1164_v45 }
 0x87a   :  { %v1168_v52 = vmul.f32 %v3587_v37, %v1166_v50  ;;  %v1167_v53 = vmul.f32 %v3580_v34, %v1166_v50  ;;  %v743_v34 = vadd.s32 1, %v3553_v4  ;;  %v741_v37 = vmul.u32 8, %v3553_v4 }
 0x87c   :  { %v1172_v54 = vsel %vm694_vm11, %v1168_v52, 0.0  ;;  %v1169_v55 = vsel %vm694_vm11, %v1167_v53, 0.0  ;;  %v744_v1 = vmul.u32 8, %v743_v34  ;;  %vm742_vm12 = vcmp.ge.s32.totalorder %v3550_v2, %v741_v37 }
 0x87d   :  { %1173 = vadd.xlane.f32.xlu1 %v1172_v54  ;;  %1170 = vadd.xlane.f32.xlu0 %v1169_v55 }
 0x87e   :  { %v3351_v57 = vpop.eup %3350  ;;  %vm745_vm13 = vcmp.lt.s32.totalorder %v3550_v2, %v744_v1  ;;  %v933_v2 = vld [vmem:[%s3937_s2 + $0xb0] sm:$0x1f] }
 0x87f   :  { %v740_v58 = vmul.f32 %v3351_v57, %v3345_v9  ;;  %v3353_v59 = vpop.eup %3352  ;;  %vm746_vm14 = vmand %vm742_vm12, %vm745_vm13 }
 0x880   :  { %v738_v62 = vmul.f32 %v3353_v59, %v3343_v7  ;;  %v3014_v6 = vsel %vm746_vm14, 1.0, %v3380_v30 }
 0x881   :  { %v750_v61 = vmul.f32 %v740_v58, %v3424_v11  ;;  %v3719_v58 = vld [vmem:[%s3937_s2 + $0xd0] ss:$0 sm:$0xff] }
 0x882   :  { %v749_v0 = vmul.f32 %v738_v62, %v3422_v10  ;;  %v3016_v10 = vld [vmem:[%s3937_s2 + $0xa0] ss:$0 sm:$0xff] }
 0x883   :  { %v917_v4 = vadd.f32 %v3016_v10, %v3542_v56  ;;  %v922_v56 = vadd.f32 %v3016_v10, %v3545_v60  ;;  %v927_v14 = vadd.f32 %v3016_v10, %v3548_v63 }
 0x885   :  { %v930_v8 = vmax.f32 %v917_v4, 0.0  ;;  %v931_v12 = vmax.f32 %v922_v56, 0.0  ;;  %v932_v17 = vmax.f32 %v927_v14, 0.0 }
 0x88e   :  { %755 = vrot.lane.b32.xlu1 %v750_v61, %s3379_s17  ;;  %v3724_v61 = vld [vmem:[%s3937_s2 + $0xd8] ss:$0 sm:$0xff] }
 0x893   :  { %753 = vrot.lane.b32.xlu0 %v749_v0, %s3379_s17 }
 0x906   :  { %v1171_v3 = vpop.xlane.xlu0 %1170  ;;  %v1174_v5 = vpop.xlane.xlu1 %1173 }
 0x907   :  { %3354 = vrcp.f32 %v1171_v3 }
 0x908   :  { %3356 = vrcp.f32 %v1174_v5 }
 0x90a   :  { %v756_v11 = vpop.permute.xlu1 %755  ;;  %v754_v7 = vpop.permute.xlu0 %753 }
 0x90b   :  { %3182 = vmatpush3.msra.mxu0 %v756_v11 }
 0x90c   :  { %3183 = vmatprep.subr.mxu0 %v3380_v30 }
 0x90d   :  { %3184 = vmatpush3.msra.mxu0 %v754_v7 }
 0x90e   :  { %3186 = vmatmul.mubr.msk.f32.vlgmr.msra.gmra.mxu0 %vm113_vm1, %v3014_v6  ;;  %3199 = vmatprep.subr.mxu0 %v3380_v30 }
 0x90f   :  { %3200 = vmatpush3.msk.msra.mxu0 %vm210_vm2, %v933_v2  ;;  %3201 = vmatprep.mubr.msk.f32.mxu0 %vm3381_vm4, %v3380_v30 }
 0x910   :  { %3215 = vmatprep.subr.mxu0 %v3380_v30 }
 0x912   :  { %3202 = vmatmul.mubr.msk.f32.vlgmr.msra.gmra.mxu0 %vm203_vm3, %v930_v8 }
 0x913   :  { %3204 = vmatprep.mubr.msk.f32.mxu0 %vm3381_vm4, %v3380_v30 }
 0x914   :  { %v3355_v9 = vpop.eup %3354 }
 0x915   :  { %v3357_v13 = vpop.eup %3356  ;;  %v1176_v16 = vmul.f32 %v3355_v9, %v3612_v35 }
 0x916   :  { %3205 = vmatmul.mubr.msk.f32.gmra.mxu0 %vm203_vm3, %v931_v12  ;;  %v1178_v15 = vmul.f32 %v3357_v13, %v3610_v33 }
 0x917   :  { %3207 = vmatprep.mubr.msk.f32.mxu0 %vm3381_vm4, %v3380_v30  ;;  %v1179_v18 = vmul.f32 %v1176_v16, %v3529_v48 }
 0x918   :  { %v1180_v60 = vmul.f32 %v1178_v15, %v3531_v49  ;;  %v3670_v49 = vld [vmem:[%s3937_s2 + $0xa8] sm:$0x1f] }
 0x919   :  { %3223 = vmatpush3.msk.msra.mxu1 %vm210_vm2, %v3670_v49 }
 0x91a   :  { %3216 = vmatpush3.msra.mxu0 %v1180_v60  ;;  %3232 = vmatprep.subr.mxu1 %v3380_v30 }
 0x91b   :  { %3208 = vmatmul.mubr.msk.f32.gmra.mxu0 %vm203_vm3, %v932_v17  ;;  %3217 = vmatprep.subr.mxu0 %v3380_v30 }
 0x91c   :  { %3218 = vmatpush3.msra.mxu0 %v1179_v18  ;;  %3219 = vmatprep.mubr.msk.f32.mxu0 %vm3381_vm4, %v3380_v30 }
 0x91d   :  { %3227 = vmatprep.subr.mxu0 %v3380_v30 }
 0x91f   :  { %3220 = vmatmul.mubr.msk.f32.vlgmr.msra.gmra.mxu0 %vm113_vm1, %v3014_v6 }
 0x920   :  { %3229 = vmatprep.mubr.msk.f32.mxu0 %vm3381_vm4, %v3380_v30  ;;  %3228 = vmatpush3.msk.msra.mxu0 %vm210_vm2, %v3693_v31 }
 0x921   :  { %3237 = vmatprep.subr.mxu0 %v3380_v30 }
 0x9ce   :  { %v3675_v48 = vpop.f32.mrf.mxu0 }
 0x9d0   :  { %v3187_v63 = vpop.f32.mrf.mxu0 }
 0x9d2   :  { %v1017_v19 = vpop.f32.mrf.mxu0 }
 0x9d3   :  { %v3698_v32 = vadd.f32 %v3020_v21, %v1017_v19 }
 0x9d4   :  { %v3203_v20 = vpop.f32.mrf.mxu0 }
 0x9d5   :  { %v1445_v37 = vrot.slane %v3698_v32, 2 }
 0x9d6   :  { %v1022_v22 = vpop.f32.mrf.mxu0 }
 0x9d7   :  { %v3680_v23 = vadd.f32 %v3020_v21, %v1022_v22 }
 0x9d8   :  { %v3206_v24 = vpop.f32.mrf.mxu0 }
 0x9db   :  { %v1027_v25 = vpop.f32.mrf.mxu0 }
 0x9dc   :  { %v3682_v26 = vadd.f32 %v3020_v21, %v1027_v25  ;;  %v1616_v21 = vrot.slane %v3698_v32, 4 }
 0x9dd   :  { %v3209_v27 = vpop.f32.mrf.mxu0 }
 0x9df   :  { %v1247_v28 = vpop.f32.mrf.mxu0 }
 0x9e0   :  { %3225 = vmatmul.mubr.msk.f32.vlgmr.msra.gmra.mxu1 %vm203_vm3, %v1247_v28 }
 0x9e1   :  { %v3221_v29 = vpop.f32.mrf.mxu0  ;;  %3233 = vmatpush3.msk.msra.mxu1 %vm210_vm2, %v3670_v49  ;;  %3234 = vmatprep.mubr.msk.f32.mxu1 %vm3381_vm4, %v3380_v30 }
 0x9e2   :  { %3242 = vmatprep.subr.mxu1 %v3380_v30 }
 0xaa0   :  { %v1328_v33 = vpop.f32.mrf.mxu1 }
 0xaa1   :  { %v1329_v35 = vadd.f32 %v1328_v33, %v3698_v32 }
 0xaa2   :  { %v3226_v36 = vpop.f32.mrf.mxu1 }
 0xaa3   :  { %v1332_v38 = vmax.f32 %v1329_v35, 0.0  ;;  %1414 = vrot.lane.b32.xlu1 %v1329_v35, %s3378_s27 }
 0xaa5   :  { %3230 = vmatmul.mubr.msk.f32.vlgmr.msra.gmra.mxu0 %vm203_vm3, %v1332_v38 }
 0xaa6   :  { %3238 = vmatpush3.msk.msra.mxu0 %vm210_vm2, %v3693_v31  ;;  %3239 = vmatprep.mubr.msk.f32.mxu0 %vm3381_vm4, %v3380_v30 }
 0xaa7   :  { %3247 = vmatprep.subr.mxu0 %v3380_v30 }
 0xb15   :  { %v1415_v41 = vpop.permute.xlu1 %1414 }
 0xb65   :  { %v1409_v40 = vpop.f32.mrf.mxu0 }
 0xb66   :  { %v1410_v42 = vadd.f32 %v3711_v39, %v1409_v40 }
 0xb67   :  { %v3231_v43 = vpop.f32.mrf.mxu0 }
 0xb68   :  { %v1417_v44 = vadd.f32 %v1415_v41, %v1410_v42 }
 0xb6a   :  { %v1419_v45 = vsel %vm1418_vm15, %v1417_v44, 0.0 }
 0xb6b   :  { %1420 = vadd.xlane.f32.xlu1 %v1419_v45 }
 0xbf4   :  { %v1421_v46 = vpop.xlane.xlu1 %1420 }
 0xbf5   :  { %v1422_v47 = vmul.f32 0.2, %v1421_v46 }
 0xbf7   :  { %v1423_v50 = vsub.f32 %v1417_v44, %v1422_v47 }
 0xbf9   :  { %v1424_v51 = vmul.f32 %v1423_v50, %v1423_v50 }
 0xbfb   :  { %v1425_v52 = vsel %vm1418_vm15, %v1424_v51, 0.0 }
 0xbfc   :  { %1426 = vadd.xlane.f32.xlu0 %v1425_v52 }
 0xc85   :  { %v1427_v53 = vpop.xlane.xlu0 %1426 }
 0xc86   :  { %v1428_v54 = vmul.f32 0.2, %v1427_v53 }
 0xc88   :  { %v1429_v55 = vadd.f32 1e-05, %v1428_v54 }
 0xc8a   :  { %3358 = vrsqrt.f32 %v1429_v55  ;;  %v1787_v55 = vrot.slane %v3698_v32, 6 }
 0xc97   :  { %v3359_v57 = vpop.eup %3358 }
 0xc98   :  { %v1431_v59 = vmul.f32 %v3359_v57, %v1423_v50 }
 0xc9a   :  { %v1436_v62 = vmul.f32 %v3719_v58, %v1431_v59 }
 0xc9c   :  { %v1441_v0 = vadd.f32 %v3724_v61, %v1436_v62 }
 0xc9e   :  { %v1442_v34 = vadd.f32 %v1441_v0, %v3675_v48  ;;  %3235 = vmatmul.mubr.msk.f32.vlgmr.msra.gmra.mxu1 %vm203_vm3, %v1441_v0 }
 0xc9f   :  { %3243 = vmatpush3.msk.msra.mxu1 %vm210_vm2, %v3670_v49  ;;  %3244 = vmatprep.mubr.msk.f32.mxu1 %vm3381_vm4, %v3380_v30 }
 0xca0   :  { %1443 = vst.msk [vmem:[%s3940_s3] sm:$0x3] %vm1418_vm15, %v1442_v34  ;;  %3252 = vmatprep.subr.mxu1 %v3380_v30 }
 0xd5e   :  { %v1516_v1 = vpop.f32.mrf.mxu1 }
 0xd5f   :  { %v1517_v3 = vadd.f32 %v1516_v1, %v1445_v37 }
 0xd60   :  { %v3236_v5 = vpop.f32.mrf.mxu1 }
 0xd61   :  { %v1520_v10 = vmax.f32 %v1517_v3, 0.0  ;;  %1595 = vrot.lane.b32.xlu0 %v1517_v3, %s3378_s27 }
 0xd63   :  { %3240 = vmatmul.mubr.msk.f32.vlgmr.msra.gmra.mxu0 %vm203_vm3, %v1520_v10 }
 0xd64   :  { %3248 = vmatpush3.msk.msra.mxu0 %vm210_vm2, %v3693_v31  ;;  %3249 = vmatprep.mubr.msk.f32.mxu0 %vm3381_vm4, %v3380_v30 }
 0xd65   :  { %3257 = vmatprep.subr.mxu0 %v3380_v30 }
 0xdd3   :  { %v1596_v4 = vpop.permute.xlu0 %1595 }
 0xe23   :  { %v1590_v11 = vpop.f32.mrf.mxu0 }
 0xe24   :  { %v1591_v6 = vadd.f32 %v3711_v39, %v1590_v11 }
 0xe25   :  { %v3241_v7 = vpop.f32.mrf.mxu0 }
 0xe26   :  { %v1598_v2 = vadd.f32 %v1596_v4, %v1591_v6 }
 0xe28   :  { %v1599_v8 = vsel %vm1418_vm15, %v1598_v2, 0.0 }
 0xe29   :  { %1600 = vadd.xlane.f32.xlu1 %v1599_v8 }
 0xeb2   :  { %v1601_v56 = vpop.xlane.xlu1 %1600 }
 0xeb3   :  { %v1602_v9 = vmul.f32 0.2, %v1601_v56 }
 0xeb5   :  { %v1603_v12 = vsub.f32 %v1598_v2, %v1602_v9 }
 0xeb7   :  { %v1604_v13 = vmul.f32 %v1603_v12, %v1603_v12 }
 0xeb9   :  { %v1605_v14 = vsel %vm1418_vm15, %v1604_v13, 0.0 }
 0xeba   :  { %1606 = vadd.xlane.f32.xlu1 %v1605_v14 }
 0xf43   :  { %v1607_v15 = vpop.xlane.xlu1 %1606 }
 0xf44   :  { %v1608_v16 = vmul.f32 0.2, %v1607_v15 }
 0xf46   :  { %v1609_v60 = vadd.f32 1e-05, %v1608_v16 }
 0xf48   :  { %3360 = vrsqrt.f32 %v1609_v60 }
 0xf55   :  { %v3361_v17 = vpop.eup %3360 }
 0xf56   :  { %v1611_v18 = vmul.f32 %v3361_v17, %v1603_v12 }
 0xf58   :  { %v1612_v63 = vmul.f32 %v3719_v58, %v1611_v18 }
 0xf5a   :  { %v1613_v19 = vadd.f32 %v3724_v61, %v1612_v63 }
 0xf5c   :  { %v1614_v20 = vadd.f32 %v1613_v19, %v3675_v48  ;;  %3245 = vmatmul.mubr.msk.f32.vlgmr.msra.gmra.mxu1 %vm203_vm3, %v1613_v19 }
 0xf5d   :  { %3253 = vmatpush3.msk.msra.mxu1 %vm210_vm2, %v3670_v49  ;;  %3254 = vmatprep.mubr.msk.f32.mxu1 %vm3381_vm4, %v3380_v30 }
 0xf5e   :  { %1615 = vst.msk [vmem:[%s3940_s3 + $0x2] sm:$0x3] %vm1418_vm15, %v1614_v20  ;;  %3262 = vmatprep.subr.mxu1 %v3380_v30 }
0x101c   :  { %v1687_v22 = vpop.f32.mrf.mxu1 }
0x101d   :  { %v1688_v24 = vadd.f32 %v1687_v22, %v1616_v21 }
0x101e   :  { %v3246_v25 = vpop.f32.mrf.mxu1 }
0x101f   :  { %v1691_v27 = vmax.f32 %v1688_v24, 0.0  ;;  %1766 = vrot.lane.b32.xlu1 %v1688_v24, %s3378_s27 }
0x1021   :  { %3250 = vmatmul.mubr.msk.f32.vlgmr.msra.gmra.mxu0 %vm203_vm3, %v1691_v27 }
0x1022   :  { %3258 = vmatpush3.msk.msra.mxu0 %vm210_vm2, %v3693_v31  ;;  %3259 = vmatprep.mubr.msk.f32.mxu0 %vm3381_vm4, %v3380_v30 }
0x1023   :  { %3267 = vmatprep.subr.mxu0 %v3380_v30 }
0x1091   :  { %v1767_v33 = vpop.permute.xlu1 %1766 }
0x10e1   :  { %v1761_v28 = vpop.f32.mrf.mxu0 }
0x10e2   :  { %v1762_v29 = vadd.f32 %v3711_v39, %v1761_v28 }
0x10e3   :  { %v3251_v35 = vpop.f32.mrf.mxu0 }
0x10e4   :  { %v1769_v36 = vadd.f32 %v1767_v33, %v1762_v29 }
0x10e6   :  { %v1770_v38 = vsel %vm1418_vm15, %v1769_v36, 0.0 }
0x10e7   :  { %1771 = vadd.xlane.f32.xlu0 %v1770_v38 }
0x1170   :  { %v1772_v40 = vpop.xlane.xlu0 %1771 }
0x1171   :  { %v1773_v42 = vmul.f32 0.2, %v1772_v40 }
0x1173   :  { %v1774_v41 = vsub.f32 %v1769_v36, %v1773_v42 }
0x1175   :  { %v1775_v43 = vmul.f32 %v1774_v41, %v1774_v41 }
0x1177   :  { %v1776_v44 = vsel %vm1418_vm15, %v1775_v43, 0.0 }
0x1178   :  { %1777 = vadd.xlane.f32.xlu1 %v1776_v44 }
0x1201   :  { %v1778_v45 = vpop.xlane.xlu1 %1777 }
0x1202   :  { %v1779_v46 = vmul.f32 0.2, %v1778_v45  ;;  %v2128_v45 = vrot.slane %v3680_v23, 2 }
0x1204   :  { %v1780_v47 = vadd.f32 1e-05, %v1779_v46 }
0x1206   :  { %3362 = vrsqrt.f32 %v1780_v47 }
0x1213   :  { %v3363_v50 = vpop.eup %3362 }
0x1214   :  { %v1782_v51 = vmul.f32 %v3363_v50, %v1774_v41 }
0x1216   :  { %v1783_v52 = vmul.f32 %v3719_v58, %v1782_v51 }
0x1218   :  { %v1784_v53 = vadd.f32 %v3724_v61, %v1783_v52 }
0x121a   :  { %v1785_v54 = vadd.f32 %v1784_v53, %v3675_v48  ;;  %3255 = vmatmul.mubr.msk.f32.vlgmr.msra.gmra.mxu1 %vm203_vm3, %v1784_v53 }
0x121b   :  { %3263 = vmatpush3.msk.msra.mxu1 %vm210_vm2, %v3670_v49  ;;  %3264 = vmatprep.mubr.msk.f32.mxu1 %vm3381_vm4, %v3380_v30 }
0x121c   :  { %1786 = vst.msk [vmem:[%s3940_s3 + $0x4] sm:$0x3] %vm1418_vm15, %v1785_v54  ;;  %3272 = vmatprep.subr.mxu1 %v3380_v30 }
0x12da   :  { %v1858_v57 = vpop.f32.mrf.mxu1 }
0x12db   :  { %v1859_v59 = vadd.f32 %v1858_v57, %v1787_v55 }
0x12dc   :  { %v3256_v62 = vpop.f32.mrf.mxu1 }
0x12dd   :  { %v1862_v0 = vmax.f32 %v1859_v59, 0.0  ;;  %1937 = vrot.lane.b32.xlu0 %v1859_v59, %s3378_s27 }
0x12df   :  { %3260 = vmatmul.mubr.msk.f32.vlgmr.msra.gmra.mxu0 %vm203_vm3, %v1862_v0 }
0x12e0   :  { %3268 = vmatpush3.msk.msra.mxu0 %vm210_vm2, %v3693_v31  ;;  %3269 = vmatprep.mubr.msk.f32.mxu0 %vm3381_vm4, %v3380_v30 }
0x12e1   :  { %3277 = vmatprep.subr.mxu0 %v3380_v30 }
0x134f   :  { %v1938_v32 = vpop.permute.xlu0 %1937 }
0x139f   :  { %v1932_v34 = vpop.f32.mrf.mxu0 }
0x13a0   :  { %v1933_v37 = vadd.f32 %v3711_v39, %v1932_v34 }
0x13a1   :  { %v3261_v1 = vpop.f32.mrf.mxu0 }
0x13a2   :  { %v1940_v3 = vadd.f32 %v1938_v32, %v1933_v37 }
0x13a4   :  { %v1941_v5 = vsel %vm1418_vm15, %v1940_v3, 0.0 }
0x13a5   :  { %1942 = vadd.xlane.f32.xlu1 %v1941_v5 }
0x142e   :  { %v1943_v10 = vpop.xlane.xlu1 %1942 }
0x142f   :  { %v1944_v11 = vmul.f32 0.2, %v1943_v10 }
0x1431   :  { %v1945_v6 = vsub.f32 %v1940_v3, %v1944_v11 }
0x1433   :  { %v1946_v4 = vmul.f32 %v1945_v6, %v1945_v6 }
0x1435   :  { %v1947_v7 = vsel %vm1418_vm15, %v1946_v4, 0.0 }
0x1436   :  { %1948 = vadd.xlane.f32.xlu1 %v1947_v7 }
0x14bf   :  { %v1949_v2 = vpop.xlane.xlu1 %1948 }
0x14c0   :  { %v1950_v8 = vmul.f32 0.2, %v1949_v2  ;;  %v2299_v2 = vrot.slane %v3680_v23, 4 }
0x14c2   :  { %v1951_v56 = vadd.f32 1e-05, %v1950_v8 }
0x14c4   :  { %3364 = vrsqrt.f32 %v1951_v56 }
0x14d1   :  { %v3365_v9 = vpop.eup %3364 }
0x14d2   :  { %v1953_v12 = vmul.f32 %v3365_v9, %v1945_v6 }
0x14d4   :  { %v1954_v13 = vmul.f32 %v3719_v58, %v1953_v12 }
0x14d6   :  { %v1955_v14 = vadd.f32 %v3724_v61, %v1954_v13 }
0x14d8   :  { %v1956_v15 = vadd.f32 %v1955_v14, %v3675_v48  ;;  %3265 = vmatmul.mubr.msk.f32.vlgmr.msra.gmra.mxu1 %vm203_vm3, %v1955_v14 }
0x14d9   :  { %3273 = vmatpush3.msk.msra.mxu1 %vm210_vm2, %v3670_v49  ;;  %3274 = vmatprep.mubr.msk.f32.mxu1 %vm3381_vm4, %v3380_v30 }
0x14da   :  { %1957 = vst.msk [vmem:[%s3940_s3 + $0x6] sm:$0x3] %vm1418_vm15, %v1956_v15  ;;  %3282 = vmatprep.subr.mxu1 %v3380_v30 }
0x1598   :  { %v2027_v16 = vpop.f32.mrf.mxu1 }
0x1599   :  { %v2028_v60 = vadd.f32 %v2027_v16, %v3680_v23 }
0x159a   :  { %v3266_v17 = vpop.f32.mrf.mxu1 }
0x159b   :  { %v2031_v18 = vmax.f32 %v2028_v60, 0.0  ;;  %2106 = vrot.lane.b32.xlu1 %v2028_v60, %s3378_s27 }
0x159d   :  { %3270 = vmatmul.mubr.msk.f32.vlgmr.msra.gmra.mxu0 %vm203_vm3, %v2031_v18 }
0x159e   :  { %3278 = vmatpush3.msk.msra.mxu0 %vm210_vm2, %v3693_v31  ;;  %3279 = vmatprep.mubr.msk.f32.mxu0 %vm3381_vm4, %v3380_v30 }
0x159f   :  { %3287 = vmatprep.subr.mxu0 %v3380_v30 }
0x160d   :  { %v2107_v20 = vpop.permute.xlu1 %2106 }
0x165d   :  { %v2101_v63 = vpop.f32.mrf.mxu0 }
0x165e   :  { %v2102_v19 = vadd.f32 %v3711_v39, %v2101_v63 }
0x165f   :  { %v3271_v21 = vpop.f32.mrf.mxu0 }
0x1660   :  { %v2109_v22 = vadd.f32 %v2107_v20, %v2102_v19 }
0x1662   :  { %v2110_v24 = vsel %vm1418_vm15, %v2109_v22, 0.0 }
0x1663   :  { %2111 = vadd.xlane.f32.xlu0 %v2110_v24 }
0x16ec   :  { %v2112_v25 = vpop.xlane.xlu0 %2111 }
0x16ed   :  { %v2113_v27 = vmul.f32 0.2, %v2112_v25 }
0x16ef   :  { %v2114_v28 = vsub.f32 %v2109_v22, %v2113_v27 }
0x16f1   :  { %v2115_v29 = vmul.f32 %v2114_v28, %v2114_v28 }
0x16f3   :  { %v2116_v33 = vsel %vm1418_vm15, %v2115_v29, 0.0 }
0x16f4   :  { %2117 = vadd.xlane.f32.xlu1 %v2116_v33 }
0x177d   :  { %v2118_v35 = vpop.xlane.xlu1 %2117 }
0x177e   :  { %v2119_v36 = vmul.f32 0.2, %v2118_v35 }
0x1780   :  { %v2120_v38 = vadd.f32 1e-05, %v2119_v36  ;;  %v2470_v36 = vrot.slane %v3680_v23, 6 }
0x1782   :  { %3366 = vrsqrt.f32 %v2120_v38 }
0x178f   :  { %v3367_v40 = vpop.eup %3366 }
0x1790   :  { %v2122_v42 = vmul.f32 %v3367_v40, %v2114_v28 }
0x1792   :  { %v2123_v41 = vmul.f32 %v3719_v58, %v2122_v42 }
0x1794   :  { %v2124_v43 = vadd.f32 %v3724_v61, %v2123_v41 }
0x1796   :  { %v2125_v44 = vadd.f32 %v2124_v43, %v3675_v48  ;;  %3275 = vmatmul.mubr.msk.f32.vlgmr.msra.gmra.mxu1 %vm203_vm3, %v2124_v43 }
0x1797   :  { %3283 = vmatpush3.msk.msra.mxu1 %vm210_vm2, %v3670_v49  ;;  %3284 = vmatprep.mubr.msk.f32.mxu1 %vm3381_vm4, %v3380_v30 }
0x1798   :  { %2126 = vst.msk [vmem:[%s3940_s3 + $0x8] sm:$0x3] %vm1418_vm15, %v2125_v44  ;;  %3292 = vmatprep.subr.mxu1 %v3380_v30 }
0x1856   :  { %v2199_v46 = vpop.f32.mrf.mxu1 }
0x1857   :  { %v2200_v47 = vadd.f32 %v2199_v46, %v2128_v45 }
0x1858   :  { %v3276_v50 = vpop.f32.mrf.mxu1 }
0x1859   :  { %v2203_v51 = vmax.f32 %v2200_v47, 0.0  ;;  %2278 = vrot.lane.b32.xlu0 %v2200_v47, %s3378_s27 }
0x185b   :  { %3280 = vmatmul.mubr.msk.f32.vlgmr.msra.gmra.mxu0 %vm203_vm3, %v2203_v51 }
0x185c   :  { %3288 = vmatpush3.msk.msra.mxu0 %vm210_vm2, %v3693_v31  ;;  %3289 = vmatprep.mubr.msk.f32.mxu0 %vm3381_vm4, %v3380_v30 }
0x185d   :  { %3297 = vmatprep.subr.mxu0 %v3380_v30 }
0x18cb   :  { %v2279_v54 = vpop.permute.xlu0 %2278 }
0x191b   :  { %v2273_v52 = vpop.f32.mrf.mxu0 }
0x191c   :  { %v2274_v53 = vadd.f32 %v3711_v39, %v2273_v52 }
0x191d   :  { %v3281_v55 = vpop.f32.mrf.mxu0 }
0x191e   :  { %v2281_v57 = vadd.f32 %v2279_v54, %v2274_v53 }
0x1920   :  { %v2282_v59 = vsel %vm1418_vm15, %v2281_v57, 0.0 }
0x1921   :  { %2283 = vadd.xlane.f32.xlu1 %v2282_v59 }
0x19aa   :  { %v2284_v62 = vpop.xlane.xlu1 %2283 }
0x19ab   :  { %v2285_v0 = vmul.f32 0.2, %v2284_v62 }
0x19ad   :  { %v2286_v34 = vsub.f32 %v2281_v57, %v2285_v0 }
0x19af   :  { %v2287_v37 = vmul.f32 %v2286_v34, %v2286_v34 }
0x19b1   :  { %v2288_v32 = vsel %vm1418_vm15, %v2287_v37, 0.0 }
0x19b2   :  { %2289 = vadd.xlane.f32.xlu1 %v2288_v32 }
0x1a3b   :  { %v2290_v1 = vpop.xlane.xlu1 %2289 }
0x1a3c   :  { %v2291_v3 = vmul.f32 0.2, %v2290_v1 }
0x1a3e   :  { %v2292_v5 = vadd.f32 1e-05, %v2291_v3 }
0x1a40   :  { %3368 = vrsqrt.f32 %v2292_v5 }
0x1a4d   :  { %v3369_v10 = vpop.eup %3368 }
0x1a4e   :  { %v2294_v11 = vmul.f32 %v3369_v10, %v2286_v34 }
0x1a50   :  { %v2295_v6 = vmul.f32 %v3719_v58, %v2294_v11 }
0x1a52   :  { %v2296_v4 = vadd.f32 %v3724_v61, %v2295_v6 }
0x1a54   :  { %v2297_v7 = vadd.f32 %v2296_v4, %v3675_v48  ;;  %3285 = vmatmul.mubr.msk.f32.vlgmr.msra.gmra.mxu1 %vm203_vm3, %v2296_v4 }
0x1a55   :  { %3293 = vmatpush3.msk.msra.mxu1 %vm210_vm2, %v3670_v49  ;;  %3294 = vmatprep.mubr.msk.f32.mxu1 %vm3381_vm4, %v3380_v30 }
0x1a56   :  { %2298 = vst.msk [vmem:[%s3940_s3 + $0xa] sm:$0x3] %vm1418_vm15, %v2297_v7  ;;  %3302 = vmatprep.subr.mxu1 %v3380_v30 }
0x1b14   :  { %v2370_v8 = vpop.f32.mrf.mxu1 }
0x1b15   :  { %v2371_v56 = vadd.f32 %v2370_v8, %v2299_v2 }
0x1b16   :  { %v3286_v9 = vpop.f32.mrf.mxu1 }
0x1b17   :  { %v2374_v12 = vmax.f32 %v2371_v56, 0.0  ;;  %2449 = vrot.lane.b32.xlu0 %v2371_v56, %s3378_s27 }
0x1b19   :  { %3290 = vmatmul.mubr.msk.f32.vlgmr.msra.gmra.mxu0 %vm203_vm3, %v2374_v12 }
0x1b1a   :  { %3298 = vmatpush3.msk.msra.mxu0 %vm210_vm2, %v3693_v31  ;;  %3299 = vmatprep.mubr.msk.f32.mxu0 %vm3381_vm4, %v3380_v30 }
0x1b1b   :  { %3307 = vmatprep.subr.mxu0 %v3380_v30 }
0x1b89   :  { %v2450_v15 = vpop.permute.xlu0 %2449 }
0x1bd9   :  { %v2444_v13 = vpop.f32.mrf.mxu0 }
0x1bda   :  { %v2445_v14 = vadd.f32 %v3711_v39, %v2444_v13 }
0x1bdb   :  { %v3291_v16 = vpop.f32.mrf.mxu0 }
0x1bdc   :  { %v2452_v60 = vadd.f32 %v2450_v15, %v2445_v14 }
0x1bde   :  { %v2453_v17 = vsel %vm1418_vm15, %v2452_v60, 0.0 }
0x1bdf   :  { %2454 = vadd.xlane.f32.xlu1 %v2453_v17 }
0x1c68   :  { %v2455_v18 = vpop.xlane.xlu1 %2454 }
0x1c69   :  { %v2456_v63 = vmul.f32 0.2, %v2455_v18 }
0x1c6b   :  { %v2457_v19 = vsub.f32 %v2452_v60, %v2456_v63  ;;  %v2811_v63 = vrot.slane %v3682_v26, 2 }
0x1c6d   :  { %v2458_v20 = vmul.f32 %v2457_v19, %v2457_v19 }
0x1c6f   :  { %v2459_v21 = vsel %vm1418_vm15, %v2458_v20, 0.0 }
0x1c70   :  { %2460 = vadd.xlane.f32.xlu0 %v2459_v21 }
0x1cf9   :  { %v2461_v22 = vpop.xlane.xlu0 %2460 }
0x1cfa   :  { %v2462_v24 = vmul.f32 0.2, %v2461_v22 }
0x1cfc   :  { %v2463_v25 = vadd.f32 1e-05, %v2462_v24 }
0x1cfe   :  { %3370 = vrsqrt.f32 %v2463_v25 }
0x1d0b   :  { %v3371_v27 = vpop.eup %3370 }
0x1d0c   :  { %v2465_v28 = vmul.f32 %v3371_v27, %v2457_v19 }
0x1d0e   :  { %v2466_v29 = vmul.f32 %v3719_v58, %v2465_v28 }
0x1d10   :  { %v2467_v33 = vadd.f32 %v3724_v61, %v2466_v29 }
0x1d12   :  { %v2468_v35 = vadd.f32 %v2467_v33, %v3675_v48  ;;  %3295 = vmatmul.mubr.msk.f32.vlgmr.msra.gmra.mxu1 %vm203_vm3, %v2467_v33 }
0x1d13   :  { %3303 = vmatpush3.msk.msra.mxu1 %vm210_vm2, %v3670_v49  ;;  %3304 = vmatprep.mubr.msk.f32.mxu1 %vm3381_vm4, %v3380_v30 }
0x1d14   :  { %2469 = vst.msk [vmem:[%s3940_s3 + $0xc] sm:$0x3] %vm1418_vm15, %v2468_v35  ;;  %3312 = vmatprep.subr.mxu1 %v3380_v30 }
0x1dd2   :  { %v2541_v38 = vpop.f32.mrf.mxu1 }
0x1dd3   :  { %v2542_v40 = vadd.f32 %v2541_v38, %v2470_v36 }
0x1dd4   :  { %v3296_v42 = vpop.f32.mrf.mxu1 }
0x1dd5   :  { %v2545_v41 = vmax.f32 %v2542_v40, 0.0  ;;  %2620 = vrot.lane.b32.xlu1 %v2542_v40, %s3378_s27 }
0x1dd7   :  { %3300 = vmatmul.mubr.msk.f32.vlgmr.msra.gmra.mxu0 %vm203_vm3, %v2545_v41 }
0x1dd8   :  { %3308 = vmatpush3.msk.msra.mxu0 %vm210_vm2, %v3693_v31  ;;  %3309 = vmatprep.mubr.msk.f32.mxu0 %vm3381_vm4, %v3380_v30 }
0x1dd9   :  { %3317 = vmatprep.subr.mxu0 %v3380_v30 }
0x1e47   :  { %v2621_v23 = vpop.permute.xlu1 %2620 }
0x1e97   :  { %v2615_v43 = vpop.f32.mrf.mxu0 }
0x1e98   :  { %v2616_v44 = vadd.f32 %v3711_v39, %v2615_v43 }
0x1e99   :  { %v3301_v45 = vpop.f32.mrf.mxu0 }
0x1e9a   :  { %v2623_v46 = vadd.f32 %v2621_v23, %v2616_v44 }
0x1e9c   :  { %v2624_v47 = vsel %vm1418_vm15, %v2623_v46, 0.0 }
0x1e9d   :  { %2625 = vadd.xlane.f32.xlu1 %v2624_v47 }
0x1f26   :  { %v2626_v50 = vpop.xlane.xlu1 %2625 }
0x1f27   :  { %v2627_v51 = vmul.f32 0.2, %v2626_v50 }
0x1f29   :  { %v2628_v52 = vsub.f32 %v2623_v46, %v2627_v51 }
0x1f2b   :  { %v2629_v53 = vmul.f32 %v2628_v52, %v2628_v52 }
0x1f2d   :  { %v2630_v54 = vsel %vm1418_vm15, %v2629_v53, 0.0 }
0x1f2e   :  { %2631 = vadd.xlane.f32.xlu0 %v2630_v54 }
0x1fb7   :  { %v2632_v55 = vpop.xlane.xlu0 %2631 }
0x1fb8   :  { %v2633_v57 = vmul.f32 0.2, %v2632_v55 }
0x1fba   :  { %v2634_v59 = vadd.f32 1e-05, %v2633_v57 }
0x1fbc   :  { %3372 = vrsqrt.f32 %v2634_v59 }
0x1fc9   :  { %v3373_v62 = vpop.eup %3372 }
0x1fca   :  { %v2636_v0 = vmul.f32 %v3373_v62, %v2628_v52 }
0x1fcc   :  { %v2637_v34 = vmul.f32 %v3719_v58, %v2636_v0 }
0x1fce   :  { %v2638_v37 = vadd.f32 %v3724_v61, %v2637_v34 }
0x1fd0   :  { %v2639_v32 = vadd.f32 %v2638_v37, %v3675_v48  ;;  %3305 = vmatmul.mubr.msk.f32.vlgmr.msra.gmra.mxu1 %vm203_vm3, %v2638_v37 }
0x1fd1   :  { %3313 = vmatpush3.msk.msra.mxu1 %vm210_vm2, %v3670_v49  ;;  %3314 = vmatprep.mubr.msk.f32.mxu1 %vm3381_vm4, %v3380_v30 }
0x1fd2   :  { %2640 = vst.msk [vmem:[%s3940_s3 + $0xe] sm:$0x3] %vm1418_vm15, %v2639_v32 }
0x2090   :  { %v2710_v1 = vpop.f32.mrf.mxu1 }
0x2091   :  { %v2711_v3 = vadd.f32 %v2710_v1, %v3682_v26 }
0x2092   :  { %v3306_v5 = vpop.f32.mrf.mxu1 }
0x2093   :  { %v2714_v10 = vmax.f32 %v2711_v3, 0.0  ;;  %2789 = vrot.lane.b32.xlu0 %v2711_v3, %s3378_s27 }
0x2095   :  { %3310 = vmatmul.mubr.msk.f32.vlgmr.msra.gmra.mxu0 %vm203_vm3, %v2714_v10 }
0x2096   :  { %3318 = vmatpush3.msk.msra.mxu0 %vm210_vm2, %v3693_v31  ;;  %3319 = vmatprep.mubr.msk.f32.mxu0 %vm3381_vm4, %v3380_v30 }
0x2105   :  { %v2790_v6 = vpop.permute.xlu0 %2789 }
0x2155   :  { %v2784_v49 = vpop.f32.mrf.mxu0 }
0x2156   :  { %v2785_v11 = vadd.f32 %v3711_v39, %v2784_v49 }
0x2157   :  { %v3311_v4 = vpop.f32.mrf.mxu0 }
0x2158   :  { %v2792_v7 = vadd.f32 %v2790_v6, %v2785_v11 }
0x215a   :  { %v2793_v2 = vsel %vm1418_vm15, %v2792_v7, 0.0 }
0x215b   :  { %2794 = vadd.xlane.f32.xlu1 %v2793_v2 }
0x21e4   :  { %v2795_v8 = vpop.xlane.xlu1 %2794 }
0x21e5   :  { %v2796_v56 = vmul.f32 0.2, %v2795_v8 }
0x21e7   :  { %v2797_v9 = vsub.f32 %v2792_v7, %v2796_v56 }
0x21e9   :  { %v2798_v12 = vmul.f32 %v2797_v9, %v2797_v9 }
0x21eb   :  { %v2799_v13 = vsel %vm1418_vm15, %v2798_v12, 0.0 }
0x21ec   :  { %2800 = vadd.xlane.f32.xlu0 %v2799_v13 }
0x2275   :  { %v2801_v31 = vpop.xlane.xlu0 %2800 }
0x2276   :  { %v2802_v14 = vmul.f32 0.2, %v2801_v31 }
0x2278   :  { %v2803_v15 = vadd.f32 1e-05, %v2802_v14 }
0x227a   :  { %3374 = vrsqrt.f32 %v2803_v15 }
0x2287   :  { %v3375_v30 = vpop.eup %3374 }
0x2288   :  { %v2805_v16 = vmul.f32 %v3375_v30, %v2797_v9 }
0x228a   :  { %v2806_v60 = vmul.f32 %v3719_v58, %v2805_v16 }
0x228c   :  { %v2807_v17 = vadd.f32 %v3724_v61, %v2806_v60 }
0x228e   :  { %v2808_v18 = vadd.f32 %v2807_v17, %v3675_v48  ;;  %3315 = vmatmul.mubr.msk.f32.vlgmr.msra.gmra.mxu1 %vm203_vm3, %v2807_v17 }
0x2290   :  { %2809 = vst.msk [vmem:[%s3940_s3 + $0x10] sm:$0x3] %vm1418_vm15, %v2808_v18 }
0x234e   :  { %v2882_v19 = vpop.f32.mrf.mxu1 }
0x234f   :  { %v2883_v20 = vadd.f32 %v2882_v19, %v2811_v63 }
0x2350   :  { %v3316_v21 = vpop.f32.mrf.mxu1 }
0x2351   :  { %v2886_v22 = vmax.f32 %v2883_v20, 0.0  ;;  %2961 = vrot.lane.b32.xlu1 %v2883_v20, %s3378_s27 }
0x2353   :  { %3320 = vmatmul.mubr.msk.f32.vlgmr.msra.gmra.mxu0 %vm203_vm3, %v2886_v22 }
0x23c3   :  { %v2962_v27 = vpop.permute.xlu1 %2961 }
0x2413   :  { %v2956_v24 = vpop.f32.mrf.mxu0 }
0x2414   :  { %v2957_v25 = vadd.f32 %v3711_v39, %v2956_v24 }
0x2415   :  { %v3321_v28 = vpop.f32.mrf.mxu0 }
0x2416   :  { %v2964_v29 = vadd.f32 %v2962_v27, %v2957_v25 }
0x2418   :  { %v2965_v33 = vsel %vm1418_vm15, %v2964_v29, 0.0 }
0x2419   :  { %2966 = vadd.xlane.f32.xlu1 %v2965_v33 }
0x24a2   :  { %v2967_v35 = vpop.xlane.xlu1 %2966 }
0x24a3   :  { %v2968_v36 = vmul.f32 0.2, %v2967_v35 }
0x24a5   :  { %v2969_v26 = vsub.f32 %v2964_v29, %v2968_v36 }
0x24a7   :  { %v2970_v38 = vmul.f32 %v2969_v26, %v2969_v26 }
0x24a9   :  { %v2971_v40 = vsel %vm1418_vm15, %v2970_v38, 0.0 }
0x24aa   :  { %2972 = vadd.xlane.f32.xlu0 %v2971_v40 }
0x2533   :  { %v2973_v42 = vpop.xlane.xlu0 %2972 }
0x2534   :  { %v2974_v41 = vmul.f32 0.2, %v2973_v42 }
0x2536   :  { %v2975_v43 = vadd.f32 1e-05, %v2974_v41 }
0x2538   :  { %3376 = vrsqrt.f32 %v2975_v43 }
0x2545   :  { %v3377_v44 = vpop.eup %3376 }
0x2546   :  { %v2977_v23 = vmul.f32 %v3377_v44, %v2969_v26 }
0x2548   :  { %v2978_v39 = vmul.f32 %v3719_v58, %v2977_v23 }
0x254a   :  { %v2979_v45 = vadd.f32 %v3724_v61, %v2978_v39 }
0x254c   :  { %v2980_v46 = vadd.f32 %v2979_v45, %v3675_v48 }
0x254e   :  { %2981 = vst.msk [vmem:[%s3940_s3 + $0x12] sm:$0x3] %vm1418_vm15, %v2980_v46 }

</bundles_post_ra>
